<compile_context>
chip_gen: v7x
topology: tpu7x:2x2x1
jax: 0.10.0
libtpu: 0.0.40
codegen_flags: <defaults>
</compile_context>

<pallas_src>
import jax
import jax.numpy as jnp
from jax import lax
from jax.experimental import pallas as pl
from jax.experimental.pallas import tpu as pltpu

NEG_SLOPE = 0.01   # F.leaky_relu default
BN_EPS = 1e-5


def fold_bn(gamma, beta, mean, var):
    """Inference-form BatchNorm -> (scale, bias)."""
    scale = gamma / jnp.sqrt(var + BN_EPS)
    bias = beta - mean * scale
    return scale, bias


def _leaky(y):
    # slope in (0,1) => leaky_relu(y) == max(y, slope*y); 2 VALU ops.
    return jnp.maximum(y, NEG_SLOPE * y)


def _row_tile(H, target=8):
    """Largest divisor of H that is <= target (row-tile height)."""
    th = min(H, target)
    while H % th:
        th -= 1
    return th


# ----------------------------------------------------------------------------
# Fused Bottleneck kernel (one grid step == TH rows of one image)
# ----------------------------------------------------------------------------
def _make_kernel(H, W, Cin, width, Cout, TH):
    Wp = W + 2                       # padded row width (1 halo col each side)
    L = TH * Wp                      # junk-extended rows per tile for conv2
    INT_OFF = Wp                     # flat offset of first interior row
    BOT_OFF = (TH + 1) * Wp          # flat offset of bottom halo row
    n_rt = H // TH

    def kernel(x_ref, w1_ref, b1_ref, w2_ref, b2_ref, w3_ref, wsc_ref,
               b3sc_ref, o_ref, pad_ref):
        rt = pl.program_id(1)
        r0 = pl.multiple_of(rt * TH, TH)          # first interior image row

        def conv1(x2d):
            # (rows, Cin) bf16 -> (rows, width) f32, BN folded + leaky_relu
            t = jnp.dot(x2d, w1_ref[...], preferred_element_type=jnp.float32)
            return _leaky(t + b1_ref[...])

        # ---- interior rows: conv1 + stage into flat padded scratch ----------
        # (side columns interleaved as zeros so the store is one contiguous slab)
        x_int = x_ref[0, pl.ds(r0, TH), :, :]                 # (TH, W, Cin) bf16
        x_int2d = x_int.reshape(TH * W, Cin)
        t1 = conv1(x_int2d).reshape(TH, W, width)             # f32
        zc = jnp.zeros((TH, 1, width), jnp.float32)
        pad_ref[pl.ds(INT_OFF, L), :] = (
            jnp.concatenate([zc, t1, zc], axis=1)
               .reshape(L, width).astype(pad_ref.dtype))

        # ---- halo rows: recompute conv1 on the neighbour row each side; rows
        #      outside the image are zero (masked), matching padding=1.
        z1 = jnp.zeros((1, width), jnp.float32)
        mask_top = (rt > 0).astype(jnp.float32)
        x_top = x_ref[0, pl.ds(jnp.maximum(r0 - 1, 0), 1), :, :].reshape(W, Cin)
        t1_top = conv1(x_top) * mask_top                      # (W, width) f32
        pad_ref[pl.ds(0, Wp), :] = (
            jnp.concatenate([z1, t1_top, z1], axis=0).astype(pad_ref.dtype))

        mask_bot = (rt < n_rt - 1).astype(jnp.float32)
        x_bot = x_ref[0, pl.ds(jnp.minimum(r0 + TH, H - 1), 1), :, :].reshape(W, Cin)
        t1_bot = conv1(x_bot) * mask_bot                      # (W, width) f32
        z3 = jnp.zeros((3, width), jnp.float32)               # halo col + 2 slack rows
        pad_ref[pl.ds(BOT_OFF, Wp + 2), :] = (
            jnp.concatenate([z1, t1_bot, z3], axis=0).astype(pad_ref.dtype))

        # ---- conv2 (3x3, pad=1, stride=1): 3 MXU matmuls, kw-taps packed along
        #      K (=3*width), reading contiguous windows of the flat scratch.
        acc = jnp.zeros((L, width), jnp.float32)
        for kh in range(3):
            slab = jnp.concatenate(
                [pad_ref[pl.ds(kh * Wp + kw, L), :] for kw in range(3)],
                axis=-1)                                      # (L, 3*width) bf16
            acc += jnp.dot(slab, w2_ref[kh],
                           preferred_element_type=jnp.float32)
        t2_ext = _leaky(acc + b2_ref[...])                    # (L, width) f32
        # drop the 2 junk columns per row (single relayout instead of 9)
        t2 = (t2_ext.reshape(TH, Wp, width)[:, :W, :]
              .reshape(TH * W, width).astype(jnp.bfloat16))

        # ---- conv3 + shortcut (1x1 + folded BN) + fused bias + final act ----
        y = jnp.dot(t2, w3_ref[...], preferred_element_type=jnp.float32)
        y += jnp.dot(x_int2d, wsc_ref[...], preferred_element_type=jnp.float32)
        y = _leaky(y + b3sc_ref[...])                         # bias = bn3 + bn_sc
        o_ref[...] = y.reshape(1, TH, W, Cout).astype(o_ref.dtype)

    return kernel


# ----------------------------------------------------------------------------
# NHWC / bf16 entry point (use this end-to-end across blocks: no transposes)
# ----------------------------------------------------------------------------
def bottleneck_forward_nhwc(x_nhwc, p):
    N, H, W, Cin = x_nhwc.shape
    width = p["w1"].shape[1]
    Cout = p["w3"].shape[1]
    TH = _row_tile(H)
    n_rt = H // TH

    # Fold BatchNorm into conv output channels; fuse bn3 + shortcut-bn biases.
    s1, b1 = fold_bn(*p["bn1"])
    s2, b2 = fold_bn(*p["bn2"])
    s3, b3 = fold_bn(*p["bn3"])
    ssc, bsc = fold_bn(*p["bn_sc"])

    w1s = (p["w1"] * s1[None, :]).astype(jnp.bfloat16)                 # (Cin, width)
    # (3,3,width,width) -> (kh, kw*Cin, Cout): kw taps stacked along K.
    w2s = (p["w2_3x3"] * s2[None, None, None, :]
           ).reshape(3, 3 * width, width).astype(jnp.bfloat16)
    w3s = (p["w3"] * s3[None, :]).astype(jnp.bfloat16)                 # (width, Cout)
    wscs = (p["w_sc"] * ssc[None, :]).astype(jnp.bfloat16)             # (Cin, Cout)

    b1r = b1.reshape(1, width).astype(jnp.float32)
    b2r = b2.reshape(1, width).astype(jnp.float32)
    b3scr = (b3 + bsc).reshape(1, Cout).astype(jnp.float32)            # fused bias

    x = x_nhwc.astype(jnp.bfloat16)
    kernel = _make_kernel(H, W, Cin, width, Cout, TH)

    # Resident (constant index map) operands: single-buffered.
    res = dict(pipeline_mode=pl.Buffered(1))

    # TODO(synk): at toy channel counts (width=4, Cout=16) the lane dim is
    # mostly padding / masked stores; tune at lane-dense widths (>=128/256).
    out = pl.pallas_call(
        kernel,
        out_shape=jax.ShapeDtypeStruct((N, H, W, Cout), jnp.bfloat16),
        grid=(N, n_rt),
        in_specs=[
            pl.BlockSpec((1, H, W, Cin), lambda b, r: (b, 0, 0, 0)),        # x
            pl.BlockSpec((Cin, width), lambda b, r: (0, 0), **res),         # w1
            pl.BlockSpec((1, width), lambda b, r: (0, 0), **res),           # bn1 bias
            pl.BlockSpec((3, 3 * width, width), lambda b, r: (0, 0, 0), **res),  # w2
            pl.BlockSpec((1, width), lambda b, r: (0, 0), **res),           # bn2 bias
            pl.BlockSpec((width, Cout), lambda b, r: (0, 0), **res),        # w3
            pl.BlockSpec((Cin, Cout), lambda b, r: (0, 0), **res),          # shortcut w
            pl.BlockSpec((1, Cout), lambda b, r: (0, 0), **res),            # bn3+bn_sc bias
        ],
        out_specs=pl.BlockSpec((1, TH, W, Cout), lambda b, r: (b, r, 0, 0)),
        scratch_shapes=[
            # flat padded conv1 output: (TH+2) rows * (W+2) cols + 2 slack rows
            pltpu.VMEM(((TH + 2) * (W + 2) + 2, width), jnp.bfloat16),
        ],
        compiler_params=pltpu.CompilerParams(
            dimension_semantics=("parallel", "parallel"),
            vmem_limit_bytes=48 * 1024 * 1024),
    )(x, w1s, b1r, w2s, b2r, w3s, wscs, b3scr)
    return out


# ----------------------------------------------------------------------------
# NCHW wrapper (matches the PyTorch interface; transposes are only for the
# test harness -- keep NHWC/bf16 end-to-end in a real network).
# ----------------------------------------------------------------------------
def bottleneck_forward(x_nchw, p):
    x_nhwc = jnp.transpose(x_nchw, (0, 2, 3, 1))
    out_nhwc = bottleneck_forward_nhwc(x_nhwc, p)
    return jnp.transpose(out_nhwc, (0, 3, 1, 2))


# ----------------------------------------------------------------------------
# Pure-JAX reference (lax convs, NCHW, f32) faithful to the PyTorch module
# ----------------------------------------------------------------------------
def ref_forward(x, p):
    hp = lax.Precision.HIGHEST

    def conv1x1_ref(x, wmat):                       # wmat: (Cin, Cout)
        w = jnp.transpose(wmat, (1, 0))[:, :, None, None]    # OIHW
        return lax.conv_general_dilated(
            x, w, (1, 1), "VALID",
            dimension_numbers=("NCHW", "OIHW", "NCHW"), precision=hp)

    def conv3x3_ref(x, w4):                         # w4: (3, 3, Cin, Cout)
        w = jnp.transpose(w4, (3, 2, 0, 1))                  # OIHW
        return lax.conv_general_dilated(
            x, w, (1, 1), ((1, 1), (1, 1)),
            dimension_numbers=("NCHW", "OIHW", "NCHW"), precision=hp)

    def bn(x, gamma, beta, mean, var):
        s = gamma / jnp.sqrt(var + BN_EPS)
        b = beta - mean * s
        return x * s[None, :, None, None] + b[None, :, None, None]

    def act(x):
        return jnp.where(x >= 0, x, NEG_SLOPE * x)

    out = act(bn(conv1x1_ref(x, p["w1"]), *p["bn1"]))
    out = act(bn(conv3x3_ref(out, p["w2_3x3"]), *p["bn2"]))
    out = bn(conv1x1_ref(out, p["w3"]), *p["bn3"])
    sc = bn(conv1x1_ref(x, p["w_sc"]), *p["bn_sc"])
    return act(out + sc)


# ----------------------------------------------------------------------------
# Deterministic parameter construction (Bottleneck(inplanes=4, planes=4))
# ----------------------------------------------------------------------------
def make_params(key, inplanes, planes, base_width=64, groups=1):
    width = int(planes * (base_width / 64.0)) * groups
    out_planes = planes * 4  # expansion = 4
    ks = jax.random.split(key, 16)

    def w(k, shape, scale=0.2):
        return (scale * jax.random.normal(k, shape)).astype(jnp.float32)

    def bn(k, c):
        k1, k2, k3, k4 = jax.random.split(k, 4)
        gamma = 1.0 + 0.1 * jax.random.normal(k1, (c,))
        beta = 0.1 * jax.random.normal(k2, (c,))
        mean = 0.1 * jax.random.normal(k3, (c,))
        var = jax.random.uniform(k4, (c,), minval=0.5, maxval=1.5)
        return (gamma.astype(jnp.float32), beta.astype(jnp.float32),
                mean.astype(jnp.float32), var.astype(jnp.float32))

    return {
        "w1": w(ks[0], (inplanes, width)),             # 1x1 conv as (Cin, Cout)
        "w2_3x3": w(ks[1], (3, 3, width, width)),      # (KH, KW, Cin, Cout)
        "w3": w(ks[2], (width, out_planes)),
        "w_sc": w(ks[3], (inplanes, out_planes)),
        "bn1": bn(ks[4], width),
        "bn2": bn(ks[5], width),
        "bn3": bn(ks[6], out_planes),
        "bn_sc": bn(ks[7], out_planes),
    }


if __name__ == "__main__":
    key = jax.random.PRNGKey(0)
    kx, kp = jax.random.split(key)

    N, C, H, W = 2, 4, 16, 16          # inplanes = 4
    planes = 4                          # -> width = 4, out channels = 16
    x = jax.random.normal(kx, (N, C, H, W), dtype=jnp.float32)
    params = make_params(kp, inplanes=C, planes=planes)

    out = jax.block_until_ready(bottleneck_forward(x, params))
    assert out.shape == (N, planes * 4, H, W), out.shape

    ref = jax.block_until_ready(ref_forward(x, params))
    # bf16 MXU operands / bf16 output (f32 accumulation) -> tolerance reflects
    # bf16 rounding of inputs/weights/intermediates across the 3-conv chain.
    out_f32 = out.astype(jnp.float32)
    assert jnp.allclose(out_f32, ref, rtol=3e-2, atol=3e-2), (
        float(jnp.max(jnp.abs(out_f32 - ref))))

    print("KERNEL_OK")
</pallas_src>

<mosaic_0001>
module attributes {stable_mosaic.version = 11 : i64} {
  func.func @kernel(%arg0: i32, %arg1: i32, %arg2: memref<1x16x16x4xbf16, #tpu.memory_space<vmem>>, %arg3: memref<4x4xbf16, #tpu.memory_space<vmem>>, %arg4: memref<1x4xf32, #tpu.memory_space<vmem>>, %arg5: memref<3x12x4xbf16, #tpu.memory_space<vmem>>, %arg6: memref<1x4xf32, #tpu.memory_space<vmem>>, %arg7: memref<4x16xbf16, #tpu.memory_space<vmem>>, %arg8: memref<4x16xbf16, #tpu.memory_space<vmem>>, %arg9: memref<1x16xf32, #tpu.memory_space<vmem>>, %arg10: memref<1x8x16x16xbf16, #tpu.memory_space<vmem>>, %arg11: memref<182x4xbf16, #tpu.memory_space<vmem>>) attributes {dimension_semantics = [#tpu.dimension_semantics<parallel>, #tpu.dimension_semantics<parallel>], iteration_bounds = array<i64: 2, 2>, scalar_prefetch = 0 : i64, scratch_operands = 1 : i64, tpu.core_type = #tpu.core_type<tc>, window_params = [{transform_indices = @transform_0, window_bounds = array<i64: 1, 16, 16, 4>}, {pipeline_mode = #tpu.pipeline_mode<synchronous>, transform_indices = @transform_1, window_bounds = array<i64: 4, 4>}, {pipeline_mode = #tpu.pipeline_mode<synchronous>, transform_indices = @transform_2, window_bounds = array<i64: 1, 4>}, {pipeline_mode = #tpu.pipeline_mode<synchronous>, transform_indices = @transform_3, window_bounds = array<i64: 3, 12, 4>}, {pipeline_mode = #tpu.pipeline_mode<synchronous>, transform_indices = @transform_4, window_bounds = array<i64: 1, 4>}, {pipeline_mode = #tpu.pipeline_mode<synchronous>, transform_indices = @transform_5, window_bounds = array<i64: 4, 16>}, {pipeline_mode = #tpu.pipeline_mode<synchronous>, transform_indices = @transform_6, window_bounds = array<i64: 4, 16>}, {pipeline_mode = #tpu.pipeline_mode<synchronous>, transform_indices = @transform_7, window_bounds = array<i64: 1, 16>}, {transform_indices = @transform_8, window_bounds = array<i64: 1, 8, 16, 16>}]} {
    %c8_i32 = arith.constant 8 : i32
    %0 = arith.muli %arg1, %c8_i32 : i32
    %1 = tpu.assume_multiple %0, 8 : i32
    %c0 = arith.constant 0 : index
    %2 = arith.index_cast %1 : i32 to index
    %c0_0 = arith.constant 0 : index
    %c0_1 = arith.constant 0 : index
    %3 = vector.load %arg2[%c0, %2, %c0_0, %c0_1] : memref<1x16x16x4xbf16, #tpu.memory_space<vmem>>, vector<1x8x16x4xbf16>
    %4 = vector.shape_cast %3 : vector<1x8x16x4xbf16> to vector<8x16x4xbf16>
    %5 = vector.shape_cast %4 : vector<8x16x4xbf16> to vector<128x4xbf16>
    %c0_2 = arith.constant 0 : index
    %c0_3 = arith.constant 0 : index
    %6 = vector.load %arg3[%c0_2, %c0_3] : memref<4x4xbf16, #tpu.memory_space<vmem>>, vector<4x4xbf16>
    %cst = arith.constant dense<0.000000e+00> : vector<128x4xf32>
    %7 = tpu.matmul %5, %6, %cst {dimension_numbers = #tpu.dot_dimension_numbers<[1], [0], [0], [1], [0, 0, 1, 1], [], []>} : vector<128x4xbf16>, vector<4x4xbf16>, vector<128x4xf32> -> vector<128x4xf32>
    %c0_4 = arith.constant 0 : index
    %c0_5 = arith.constant 0 : index
    %8 = vector.load %arg4[%c0_4, %c0_5] : memref<1x4xf32, #tpu.memory_space<vmem>>, vector<1x4xf32>
    %9 = vector.broadcast %8 : vector<1x4xf32> to vector<128x4xf32>
    %10 = arith.addf %7, %9 : vector<128x4xf32>
    %cst_6 = arith.constant 0.00999999977 : f32
    %11 = vector.broadcast %cst_6 : f32 to vector<128x4xf32>
    %12 = arith.mulf %11, %10 : vector<128x4xf32>
    %13 = arith.maximumf %10, %12 : vector<128x4xf32>
    %14 = vector.shape_cast %13 : vector<128x4xf32> to vector<8x16x4xf32>
    %cst_7 = arith.constant 0.000000e+00 : f32
    %15 = vector.broadcast %cst_7 : f32 to vector<8x1x4xf32>
    %16 = tpu.concatenate %15, %14, %15 in 1 : vector<8x1x4xf32>, vector<8x16x4xf32>, vector<8x1x4xf32> -> vector<8x18x4xf32>
    %17 = vector.shape_cast %16 : vector<8x18x4xf32> to vector<144x4xf32>
    %18 = arith.truncf %17 : vector<144x4xf32> to vector<144x4xbf16>
    %c18 = arith.constant 18 : index
    %c0_8 = arith.constant 0 : index
    %19 = vector.load %arg11[%c18, %c0_8] : memref<182x4xbf16, #tpu.memory_space<vmem>>, vector<144x4xbf16>
    tpu.vector_store %arg11[%c18, %c0_8], %18 {strides = array<i32>} : memref<182x4xbf16, #tpu.memory_space<vmem>>, vector<144x4xbf16>,
    %cst_9 = arith.constant 0.000000e+00 : f32
    %20 = vector.broadcast %cst_9 : f32 to vector<1x4xf32>
    %c0_i32 = arith.constant 0 : i32
    %21 = arith.cmpi sgt, %arg1, %c0_i32 : i32
    %22 = arith.extui %21 : i1 to i32
    %23 = arith.sitofp %22 : i32 to f32
    %c1_i32 = arith.constant 1 : i32
    %24 = arith.subi %1, %c1_i32 : i32
    %c0_i32_10 = arith.constant 0 : i32
    %25 = arith.maxsi %24, %c0_i32_10 : i32
    %c0_11 = arith.constant 0 : index
    %26 = arith.index_cast %25 : i32 to index
    %c0_12 = arith.constant 0 : index
    %c0_13 = arith.constant 0 : index
    %27 = vector.load %arg2[%c0_11, %26, %c0_12, %c0_13] : memref<1x16x16x4xbf16, #tpu.memory_space<vmem>>, vector<1x1x16x4xbf16>
    %28 = vector.shape_cast %27 : vector<1x1x16x4xbf16> to vector<1x16x4xbf16>
    %29 = vector.shape_cast %28 : vector<1x16x4xbf16> to vector<16x4xbf16>
    %c0_14 = arith.constant 0 : index
    %c0_15 = arith.constant 0 : index
    %30 = vector.load %arg3[%c0_14, %c0_15] : memref<4x4xbf16, #tpu.memory_space<vmem>>, vector<4x4xbf16>
    %cst_16 = arith.constant dense<0.000000e+00> : vector<16x4xf32>
    %31 = tpu.matmul %29, %30, %cst_16 {dimension_numbers = #tpu.dot_dimension_numbers<[1], [0], [0], [1], [0, 0, 1, 1], [], []>} : vector<16x4xbf16>, vector<4x4xbf16>, vector<16x4xf32> -> vector<16x4xf32>
    %c0_17 = arith.constant 0 : index
    %c0_18 = arith.constant 0 : index
    %32 = vector.load %arg4[%c0_17, %c0_18] : memref<1x4xf32, #tpu.memory_space<vmem>>, vector<1x4xf32>
    %33 = vector.broadcast %32 : vector<1x4xf32> to vector<16x4xf32>
    %34 = arith.addf %31, %33 : vector<16x4xf32>
    %cst_19 = arith.constant 0.00999999977 : f32
    %35 = vector.broadcast %cst_19 : f32 to vector<16x4xf32>
    %36 = arith.mulf %35, %34 : vector<16x4xf32>
    %37 = arith.maximumf %34, %36 : vector<16x4xf32>
    %38 = vector.broadcast %23 : f32 to vector<16x4xf32>
    %39 = arith.mulf %37, %38 : vector<16x4xf32>
    %40 = tpu.concatenate %20, %39, %20 in 0 : vector<1x4xf32>, vector<16x4xf32>, vector<1x4xf32> -> vector<18x4xf32>
    %41 = arith.truncf %40 : vector<18x4xf32> to vector<18x4xbf16>
    %c0_20 = arith.constant 0 : index
    %c0_21 = arith.constant 0 : index
    %42 = vector.load %arg11[%c0_20, %c0_21] : memref<182x4xbf16, #tpu.memory_space<vmem>>, vector<18x4xbf16>
    tpu.vector_store %arg11[%c0_20, %c0_21], %41 {strides = array<i32>} : memref<182x4xbf16, #tpu.memory_space<vmem>>, vector<18x4xbf16>,
    %c1_i32_22 = arith.constant 1 : i32
    %43 = arith.cmpi slt, %arg1, %c1_i32_22 : i32
    %44 = arith.extui %43 : i1 to i32
    %45 = arith.sitofp %44 : i32 to f32
    %c8_i32_23 = arith.constant 8 : i32
    %46 = arith.addi %1, %c8_i32_23 : i32
    %c15_i32 = arith.constant 15 : i32
    %47 = arith.minsi %46, %c15_i32 : i32
    %c0_24 = arith.constant 0 : index
    %48 = arith.index_cast %47 : i32 to index
    %c0_25 = arith.constant 0 : index
    %c0_26 = arith.constant 0 : index
    %49 = vector.load %arg2[%c0_24, %48, %c0_25, %c0_26] : memref<1x16x16x4xbf16, #tpu.memory_space<vmem>>, vector<1x1x16x4xbf16>
    %50 = vector.shape_cast %49 : vector<1x1x16x4xbf16> to vector<1x16x4xbf16>
    %51 = vector.shape_cast %50 : vector<1x16x4xbf16> to vector<16x4xbf16>
    %c0_27 = arith.constant 0 : index
    %c0_28 = arith.constant 0 : index
    %52 = vector.load %arg3[%c0_27, %c0_28] : memref<4x4xbf16, #tpu.memory_space<vmem>>, vector<4x4xbf16>
    %cst_29 = arith.constant dense<0.000000e+00> : vector<16x4xf32>
    %53 = tpu.matmul %51, %52, %cst_29 {dimension_numbers = #tpu.dot_dimension_numbers<[1], [0], [0], [1], [0, 0, 1, 1], [], []>} : vector<16x4xbf16>, vector<4x4xbf16>, vector<16x4xf32> -> vector<16x4xf32>
    %c0_30 = arith.constant 0 : index
    %c0_31 = arith.constant 0 : index
    %54 = vector.load %arg4[%c0_30, %c0_31] : memref<1x4xf32, #tpu.memory_space<vmem>>, vector<1x4xf32>
    %55 = vector.broadcast %54 : vector<1x4xf32> to vector<16x4xf32>
    %56 = arith.addf %53, %55 : vector<16x4xf32>
    %cst_32 = arith.constant 0.00999999977 : f32
    %57 = vector.broadcast %cst_32 : f32 to vector<16x4xf32>
    %58 = arith.mulf %57, %56 : vector<16x4xf32>
    %59 = arith.maximumf %56, %58 : vector<16x4xf32>
    %60 = vector.broadcast %45 : f32 to vector<16x4xf32>
    %61 = arith.mulf %59, %60 : vector<16x4xf32>
    %cst_33 = arith.constant 0.000000e+00 : f32
    %62 = vector.broadcast %cst_33 : f32 to vector<3x4xf32>
    %63 = tpu.concatenate %20, %61, %62 in 0 : vector<1x4xf32>, vector<16x4xf32>, vector<3x4xf32> -> vector<20x4xf32>
    %64 = arith.truncf %63 : vector<20x4xf32> to vector<20x4xbf16>
    %c162 = arith.constant 162 : index
    %c0_34 = arith.constant 0 : index
    %65 = vector.load %arg11[%c162, %c0_34] : memref<182x4xbf16, #tpu.memory_space<vmem>>, vector<20x4xbf16>
    tpu.vector_store %arg11[%c162, %c0_34], %64 {strides = array<i32>} : memref<182x4xbf16, #tpu.memory_space<vmem>>, vector<20x4xbf16>,
    %cst_35 = arith.constant 0.000000e+00 : f32
    %66 = vector.broadcast %cst_35 : f32 to vector<144x4xf32>
    %c0_36 = arith.constant 0 : index
    %c0_37 = arith.constant 0 : index
    %67 = vector.load %arg11[%c0_36, %c0_37] : memref<182x4xbf16, #tpu.memory_space<vmem>>, vector<144x4xbf16>
    %c1 = arith.constant 1 : index
    %c0_38 = arith.constant 0 : index
    %68 = vector.load %arg11[%c1, %c0_38] : memref<182x4xbf16, #tpu.memory_space<vmem>>, vector<144x4xbf16>
    %c2 = arith.constant 2 : index
    %c0_39 = arith.constant 0 : index
    %69 = vector.load %arg11[%c2, %c0_39] : memref<182x4xbf16, #tpu.memory_space<vmem>>, vector<144x4xbf16>
    %70 = tpu.concatenate %67, %68, %69 in 1 : vector<144x4xbf16>, vector<144x4xbf16>, vector<144x4xbf16> -> vector<144x12xbf16>
    %c0_40 = arith.constant 0 : index
    %c0_41 = arith.constant 0 : index
    %c0_42 = arith.constant 0 : index
    %71 = vector.load %arg5[%c0_40, %c0_41, %c0_42] : memref<3x12x4xbf16, #tpu.memory_space<vmem>>, vector<1x12x4xbf16>
    %72 = vector.shape_cast %71 : vector<1x12x4xbf16> to vector<12x4xbf16>
    %cst_43 = arith.constant dense<0.000000e+00> : vector<144x4xf32>
    %73 = tpu.matmul %70, %72, %cst_43 {dimension_numbers = #tpu.dot_dimension_numbers<[1], [0], [0], [1], [0, 0, 1, 1], [], []>} : vector<144x12xbf16>, vector<12x4xbf16>, vector<144x4xf32> -> vector<144x4xf32>
    %74 = arith.addf %66, %73 : vector<144x4xf32>
    %c18_44 = arith.constant 18 : index
    %c0_45 = arith.constant 0 : index
    %75 = vector.load %arg11[%c18_44, %c0_45] : memref<182x4xbf16, #tpu.memory_space<vmem>>, vector<144x4xbf16>
    %c19 = arith.constant 19 : index
    %c0_46 = arith.constant 0 : index
    %76 = vector.load %arg11[%c19, %c0_46] : memref<182x4xbf16, #tpu.memory_space<vmem>>, vector<144x4xbf16>
    %c20 = arith.constant 20 : index
    %c0_47 = arith.constant 0 : index
    %77 = vector.load %arg11[%c20, %c0_47] : memref<182x4xbf16, #tpu.memory_space<vmem>>, vector<144x4xbf16>
    %78 = tpu.concatenate %75, %76, %77 in 1 : vector<144x4xbf16>, vector<144x4xbf16>, vector<144x4xbf16> -> vector<144x12xbf16>
    %c1_48 = arith.constant 1 : index
    %c0_49 = arith.constant 0 : index
    %c0_50 = arith.constant 0 : index
    %79 = vector.load %arg5[%c1_48, %c0_49, %c0_50] : memref<3x12x4xbf16, #tpu.memory_space<vmem>>, vector<1x12x4xbf16>
    %80 = vector.shape_cast %79 : vector<1x12x4xbf16> to vector<12x4xbf16>
    %cst_51 = arith.constant dense<0.000000e+00> : vector<144x4xf32>
    %81 = tpu.matmul %78, %80, %cst_51 {dimension_numbers = #tpu.dot_dimension_numbers<[1], [0], [0], [1], [0, 0, 1, 1], [], []>} : vector<144x12xbf16>, vector<12x4xbf16>, vector<144x4xf32> -> vector<144x4xf32>
    %82 = arith.addf %74, %81 : vector<144x4xf32>
    %c36 = arith.constant 36 : index
    %c0_52 = arith.constant 0 : index
    %83 = vector.load %arg11[%c36, %c0_52] : memref<182x4xbf16, #tpu.memory_space<vmem>>, vector<144x4xbf16>
    %c37 = arith.constant 37 : index
    %c0_53 = arith.constant 0 : index
    %84 = vector.load %arg11[%c37, %c0_53] : memref<182x4xbf16, #tpu.memory_space<vmem>>, vector<144x4xbf16>
    %c38 = arith.constant 38 : index
    %c0_54 = arith.constant 0 : index
    %85 = vector.load %arg11[%c38, %c0_54] : memref<182x4xbf16, #tpu.memory_space<vmem>>, vector<144x4xbf16>
    %86 = tpu.concatenate %83, %84, %85 in 1 : vector<144x4xbf16>, vector<144x4xbf16>, vector<144x4xbf16> -> vector<144x12xbf16>
    %c2_55 = arith.constant 2 : index
    %c0_56 = arith.constant 0 : index
    %c0_57 = arith.constant 0 : index
    %87 = vector.load %arg5[%c2_55, %c0_56, %c0_57] : memref<3x12x4xbf16, #tpu.memory_space<vmem>>, vector<1x12x4xbf16>
    %88 = vector.shape_cast %87 : vector<1x12x4xbf16> to vector<12x4xbf16>
    %cst_58 = arith.constant dense<0.000000e+00> : vector<144x4xf32>
    %89 = tpu.matmul %86, %88, %cst_58 {dimension_numbers = #tpu.dot_dimension_numbers<[1], [0], [0], [1], [0, 0, 1, 1], [], []>} : vector<144x12xbf16>, vector<12x4xbf16>, vector<144x4xf32> -> vector<144x4xf32>
    %90 = arith.addf %82, %89 : vector<144x4xf32>
    %c0_59 = arith.constant 0 : index
    %c0_60 = arith.constant 0 : index
    %91 = vector.load %arg6[%c0_59, %c0_60] : memref<1x4xf32, #tpu.memory_space<vmem>>, vector<1x4xf32>
    %92 = vector.broadcast %91 : vector<1x4xf32> to vector<144x4xf32>
    %93 = arith.addf %90, %92 : vector<144x4xf32>
    %cst_61 = arith.constant 0.00999999977 : f32
    %94 = vector.broadcast %cst_61 : f32 to vector<144x4xf32>
    %95 = arith.mulf %94, %93 : vector<144x4xf32>
    %96 = arith.maximumf %93, %95 : vector<144x4xf32>
    %97 = vector.shape_cast %96 : vector<144x4xf32> to vector<8x18x4xf32>
    %98 = vector.extract_strided_slice %97 {offsets = [0, 0, 0], sizes = [8, 16, 4], strides = [1, 1, 1]} : vector<8x18x4xf32> to vector<8x16x4xf32>
    %99 = vector.shape_cast %98 : vector<8x16x4xf32> to vector<128x4xf32>
    %100 = arith.truncf %99 : vector<128x4xf32> to vector<128x4xbf16>
    %c0_62 = arith.constant 0 : index
    %c0_63 = arith.constant 0 : index
    %101 = vector.load %arg7[%c0_62, %c0_63] : memref<4x16xbf16, #tpu.memory_space<vmem>>, vector<4x16xbf16>
    %cst_64 = arith.constant dense<0.000000e+00> : vector<128x16xf32>
    %102 = tpu.matmul %100, %101, %cst_64 {dimension_numbers = #tpu.dot_dimension_numbers<[1], [0], [0], [1], [0, 0, 1, 1], [], []>} : vector<128x4xbf16>, vector<4x16xbf16>, vector<128x16xf32> -> vector<128x16xf32>
    %c0_65 = arith.constant 0 : index
    %c0_66 = arith.constant 0 : index
    %103 = vector.load %arg8[%c0_65, %c0_66] : memref<4x16xbf16, #tpu.memory_space<vmem>>, vector<4x16xbf16>
    %cst_67 = arith.constant dense<0.000000e+00> : vector<128x16xf32>
    %104 = tpu.matmul %5, %103, %cst_67 {dimension_numbers = #tpu.dot_dimension_numbers<[1], [0], [0], [1], [0, 0, 1, 1], [], []>} : vector<128x4xbf16>, vector<4x16xbf16>, vector<128x16xf32> -> vector<128x16xf32>
    %105 = arith.addf %102, %104 : vector<128x16xf32>
    %c0_68 = arith.constant 0 : index
    %c0_69 = arith.constant 0 : index
    %106 = vector.load %arg9[%c0_68, %c0_69] : memref<1x16xf32, #tpu.memory_space<vmem>>, vector<1x16xf32>
    %107 = vector.broadcast %106 : vector<1x16xf32> to vector<128x16xf32>
    %108 = arith.addf %105, %107 : vector<128x16xf32>
    %cst_70 = arith.constant 0.00999999977 : f32
    %109 = vector.broadcast %cst_70 : f32 to vector<128x16xf32>
    %110 = arith.mulf %109, %108 : vector<128x16xf32>
    %111 = arith.maximumf %108, %110 : vector<128x16xf32>
    %112 = vector.shape_cast %111 : vector<128x16xf32> to vector<1x8x16x16xf32>
    %113 = arith.truncf %112 : vector<1x8x16x16xf32> to vector<1x8x16x16xbf16>
    %c0_71 = arith.constant 0 : index
    %c0_72 = arith.constant 0 : index
    %c0_73 = arith.constant 0 : index
    %c0_74 = arith.constant 0 : index
    %114 = vector.load %arg10[%c0_71, %c0_72, %c0_73, %c0_74] : memref<1x8x16x16xbf16, #tpu.memory_space<vmem>>, vector<1x8x16x16xbf16>
    tpu.vector_store %arg10[%c0_71, %c0_72, %c0_73, %c0_74], %113 {strides = array<i32>} : memref<1x8x16x16xbf16, #tpu.memory_space<vmem>>, vector<1x8x16x16xbf16>,
    return
  }
  func.func @transform_0(%arg0: i32, %arg1: i32) -> (i32, i32, i32, i32) {
    %c0_i32 = arith.constant 0 : i32
    %c0_i32_0 = arith.constant 0 : i32
    %c0_i32_1 = arith.constant 0 : i32
    %c0_i32_2 = arith.constant 0 : i32
    return %arg0, %c0_i32, %c0_i32_0, %c0_i32_1 : i32, i32, i32, i32
  }
  func.func @transform_1(%arg0: i32, %arg1: i32) -> (i32, i32) {
    %c0_i32 = arith.constant 0 : i32
    %c0_i32_0 = arith.constant 0 : i32
    %c0_i32_1 = arith.constant 0 : i32
    return %c0_i32, %c0_i32_0 : i32, i32
  }
  func.func @transform_2(%arg0: i32, %arg1: i32) -> (i32, i32) {
    %c0_i32 = arith.constant 0 : i32
    %c0_i32_0 = arith.constant 0 : i32
    %c0_i32_1 = arith.constant 0 : i32
    return %c0_i32, %c0_i32_0 : i32, i32
  }
  func.func @transform_3(%arg0: i32, %arg1: i32) -> (i32, i32, i32) {
    %c0_i32 = arith.constant 0 : i32
    %c0_i32_0 = arith.constant 0 : i32
    %c0_i32_1 = arith.constant 0 : i32
    %c0_i32_2 = arith.constant 0 : i32
    return %c0_i32, %c0_i32_0, %c0_i32_1 : i32, i32, i32
  }
  func.func @transform_4(%arg0: i32, %arg1: i32) -> (i32, i32) {
    %c0_i32 = arith.constant 0 : i32
    %c0_i32_0 = arith.constant 0 : i32
    %c0_i32_1 = arith.constant 0 : i32
    return %c0_i32, %c0_i32_0 : i32, i32
  }
  func.func @transform_5(%arg0: i32, %arg1: i32) -> (i32, i32) {
    %c0_i32 = arith.constant 0 : i32
    %c0_i32_0 = arith.constant 0 : i32
    %c0_i32_1 = arith.constant 0 : i32
    return %c0_i32, %c0_i32_0 : i32, i32
  }
  func.func @transform_6(%arg0: i32, %arg1: i32) -> (i32, i32) {
    %c0_i32 = arith.constant 0 : i32
    %c0_i32_0 = arith.constant 0 : i32
    %c0_i32_1 = arith.constant 0 : i32
    return %c0_i32, %c0_i32_0 : i32, i32
  }
  func.func @transform_7(%arg0: i32, %arg1: i32) -> (i32, i32) {
    %c0_i32 = arith.constant 0 : i32
    %c0_i32_0 = arith.constant 0 : i32
    %c0_i32_1 = arith.constant 0 : i32
    return %c0_i32, %c0_i32_0 : i32, i32
  }
  func.func @transform_8(%arg0: i32, %arg1: i32) -> (i32, i32, i32, i32) {
    %c0_i32 = arith.constant 0 : i32
    %c0_i32_0 = arith.constant 0 : i32
    %c0_i32_1 = arith.constant 0 : i32
    return %arg0, %arg1, %c0_i32, %c0_i32_0 : i32, i32, i32, i32
  }
}

</mosaic_0001>

<bundles_post_ra>
// kernel: tpu_custom_call.1
= control target key start
LH: loop header
LB: loop body
LE: loop exit
PB: predicated region body
PF: predicated region fallthrough
CT: control target
= control target key end

     0   :  { %13 = vsyncpa [#allocation4], 0  ;;  %s5798_s0 = inlined_call_operand.vmem [shape: bf16[2,16,16,4], index: 0, kind: input, shape index: {}]   ;;  %s5799_s1 = inlined_call_operand.vmem [shape: bf16[4,4], index: 1, kind: input, shape index: {}]   ;;  %s5800_s2 = inlined_call_operand.vmem [shape: f32[1,4], index: 2, kind: input, shape index: {}]   ;;  %s5801_s3 = inlined_call_operand.vmem [shape: bf16[3,12,4], index: 3, kind: input, shape index: {}]   ;;  %s5802_s4 = inlined_call_operand.vmem [shape: f32[1,4], index: 4, kind: input, shape index: {}]   ;;  %s5803_s5 = inlined_call_operand.vmem [shape: bf16[4,16], index: 5, kind: input, shape index: {}]   ;;  %s5804_s6 = inlined_call_operand.vmem [shape: bf16[4,16], index: 6, kind: input, shape index: {}]   ;;  %s5805_s7 = inlined_call_operand.vmem [shape: f32[1,16], index: 7, kind: input, shape index: {}]   ;;  %s5806_s8 = inlined_call_operand.hbm [shape: bf16[2,16,16,16], index: 8, kind: output, shape index: {}]  }
   0x1   :  { %15 = vsyncpa [#allocation4 + $0x1], 0  ;;  %s4617_s27 = smov 0   ;;  %s4619_s28 = smov 0  }
   0x2   :  { %s4621_s29 = smov 0   ;;  %s4623_s30 = smov 0  }
   0x3   :  { %s4625_s9 = smov 0   ;;  %s4627_s10 = smov 0  }
   0x4   :  { %s4629_s11 = smov 0   ;;  %s4631_s12 = smov 0  }
   0x5 LB: > { %5810 = sst [smem:[#allocation6_spill]] %s4559_s11  ;;  %s3871_s13 = sadd.s32 4294967295, %s4563_s12   ;;  %s4563_s12 = sphi %s4631_s12, %s21_s12   ;;  %s4559_s11 = sphi %s4629_s11, %s5819_s11   ;;  %s4555_s10 = sphi %s4627_s10, %s5824_s10   ;;  %s4551_s9 = sphi %s4625_s9, %s5817_s9   ;;  %s4547_s30 = sphi %s4623_s30, %s5823_s30   ;;  %s4543_s29 = sphi %s4621_s29, %s5822_s29   ;;  %s4539_s28 = sphi %s4619_s28, %s5821_s28   ;;  %s4535_s27 = sphi %s4617_s27, %s5820_s27  }
   0x6   : > { %s3872_s14 = sadd.s32 4294967294, %s4563_s12   ;;  %s30_s15 = sadd.s32 1, %s4555_s10 }
   0x7   : > { %p31_p0 = scmp.ge.s32.totalorder %s30_s15, 2  ;;  %s33_s16 = sadd.s32 1, %s4559_s11 }
   0x8   : > { %p225_p1 = scmp.ne.s32.totalorder %s4543_s29, %s4539_s28  ;;  %p226_p2 = scmp.eq.s32.totalorder %s3871_s13, 3 }
   0x9   : > { %s5826_s15 = smov (%p31_p0, %s30_s15), 0  ;;  %s5828_s16 = smov (!%p31_p0, %s33_s16), %s4559_s11 }
   0xa   : > { %5811 = sst [smem:[#allocation7_spill]] %s5826_s15  ;;  %s211_s17 = ssub.s32 %s4555_s10, %s5826_s15 }
   0xb   : > { %p4668_p3 = por %p226_p2, %p225_p1  ;;  %p35_p4 = scmp.ge.s32.totalorder %s5828_s16, 2 }
   0xc   : > { %p231_p5 = scmp.ne.s32.totalorder %s4539_s28, %s4535_s27  ;;  %p232_p6 = scmp.eq.s32.totalorder %s3872_s14, 3 }
   0xd   : > { %p3875_p7 = scmp.ge.s32.totalorder %s4563_s12, 1  ;;  %s5830_s16 = smov (%p35_p4, %s5828_s16), 0 }
   0xe   : > { %5813 = sst [smem:[#allocation8_spill]] %s5830_s16  ;;  %p4677_p8 = por %p232_p6, %p231_p5 }
   0xf   : > { %p279_p9 = scmp.lt.s32.totalorder %s4563_s12, 5  ;;  %s210_s20 = ssub.s32 %s4559_s11, %s5830_s16 }
  0x10   : > { %s215_s21 = sadd.s32 1, %s4543_s29  ;;  %s212_s22 = sor.u32 %s211_s17, %s210_s20 }
  0x11   : > { %p280_p10 = pnand %p3875_p7, %p279_p9  ;;  %p213_p11 = scmp.eq.s32.totalorder %s212_s22, 0 }
  0x12   : > { %v340_v0 = vld [vmem:[%s5799_s1] sm:$0x3] (!%p280_p10)  ;;  %vm413_vm0 = vcmask (!%p280_p10), 1041408   ;;  %p313_p12 = scmp.lt.s32.totalorder (!%p280_p10), %s4551_s9, 1  ;;  %s4039_s26 = sshll.u32 (!%p280_p10), %s4547_s30, 6  ;;  %v4565_v3 = vmov (!%p280_p10), 0.0   ;;  %v639_v19 = vlaneseq (!%p280_p10) }
  0x13   : > { %s4686_s23 = scalar_select %p213_p11, %s4543_s29, %s215_s21  }
  0x14   : > { %283 = sbr.rel (%p280_p10) target bundleno = 1081 (0x439), region = 52  ;;  %4340 = vmatprep.subr.msk.bf16.mxu0 (!%p280_p10), %vm413_vm0, %v340_v0  ;;  %v415_v1 = vsel (!%p280_p10), %vm413_vm0, %v340_v0, 0  ;;  %v1449_v2 = vld [vmem:[%s5799_s1] sm:$0x3] (!%p280_p10)  ;;  %s3879_s17 = sshll.u32 (!%p280_p10), %s4547_s30, 3  ;;  %4162 = vmatprep.subr.bf16.mxu1 (!%p280_p10), %v4565_v3  ;;  %vm4566_vm1 = vmmov (!%p280_p10), 0  }
  0x15   : > { %4145 = vmatpush3.bf16.msra.mxu0 (!%p280_p10), %v415_v1  ;;  %v1466_v4 = vsel (!%p280_p10), %vm413_vm0, %v1449_v2, 0  ;;  %4164 = vmatprep.mubr.msk.bf16.mxu1 (!%p280_p10), %vm4566_vm1, %v4565_v3  ;;  %s3917_s21 = sadd.s32 (!%p280_p10), 4294967295, %s3879_s17  ;;  %s1545_s22 = sadd.s32 (!%p280_p10), 8, %s3879_s17  ;;  %vm388_vm2 = vcmask (!%p280_p10), 31744   ;;  %v1553_v5 = vld [vmem:[%s5799_s1] sm:$0x3] (!%p280_p10) }
  0x16   : > { %4163 = vmatpush3.bf16.msra.mxu1 (!%p280_p10), %v1466_v4  ;;  %p1442_p13 = scmp.gt.s32.totalorder (!%p280_p10), %s3917_s21, 0  ;;  %4212 = vmatprep.subr.bf16.mxu0 (!%p280_p10), %v4565_v3  ;;  %p1546_p0 = scmp.lt.s32.totalorder (!%p280_p10), %s1545_s22, 15  ;;  %v1570_v9 = vsel (!%p280_p10), %vm413_vm0, %v1553_v5, 0  ;;  %v4567_v17 = vmov (!%p280_p10), 1983009808   ;;  %v640_v24 = vshrl.u32 (!%p280_p10), %v639_v19, 7 }
  0x17   : > { %4168 = vmatprep.subr.bf16.mxu1 (!%p280_p10), %v4565_v3  ;;  %p1438_p1 = scmp.gt.s32.totalorder (!%p280_p10), %s4547_s30, 0  ;;  %p1542_p2 = scmp.lt.s32.totalorder (!%p280_p10), %s4547_s30, 1  ;;  %v637_v18 = vunpack.c.l.s4 (!%p280_p10), %v4567_v17  ;;  %v4745_v20 = vld [vmem:[%s5800_s2] ss:$0 sm:$0xff] (!%p280_p10)  ;;  %vm562_vm3 = vcmask (!%p280_p10), 1040384   ;;  %vm1416_vm4 = vcmask (!%p280_p10), 27649  }
  0x18   : > { %vm1342_vm5 = vcmask (!%p280_p10), 1044484   ;;  %vm1418_vm6 = vcmask (!%p280_p10), 27648   ;;  %vm1436_vm8 = vcmask (!%p280_p10), 24576   ;;  %vm1820_vm9 = vcmask (!%p280_p10), 1046528  }
  0x19   : > { %v638_v23 = vunpack.c.0.s8 (!%p280_p10), %v637_v18  ;;  %vm4849_vm7 = vmor (!%p280_p10), %vm562_vm3, %vm1342_vm5  ;;  %vm1722_vm10 = vsmask.f32 (!%p280_p10), 7424  ;;  %vm1652_vm11 = vcmask (!%p280_p10), 26624   ;;  %vm2048_vm12 = vcmask (!%p280_p10), 1045504  }
  0x1a   : > { %vm1876_vm13 = vcmask (!%p280_p10), 64512   ;;  %vm2020_vm14 = vcmask (!%p280_p10), 97280   ;;  %vm3755_vm15 = vcmask (!%p280_p10), 125952  }
  0x1b   : > { %s314_s20 = scalar_select %p313_p12, %s4551_s9, 1  ;;  %v4760_v37 = vsub.s32 %v638_v23, %v640_v24 }
  0x1c   : > { %s5832_s21 = smov (!%p1442_p13, %s3917_s21), 0  ;;  %s5834_s22 = smov (!%p1546_p0, %s1545_s22), 15 }
  0x1d   : > { %s4037_s24 = sshll.u32 %s314_s20, 7  ;;  %s4058_s17 = sshll.u32 %s5832_s21, 3 }
  0x1e   : > { %s317_s14 = scalar_lea.vmem %s5798_s0, %s4037_s24  ;;  %s4062_s11 = sshll.u32 %s5834_s22, 3 }
  0x1f   : > { %s4709_s16 = scalar_lea.vmem %s317_s14, %s4039_s26  ;;  %s1446_s26 = scalar_lea.vmem %s317_s14, %s4058_s17 }
  0x20   : > { %v4420_v6 = vld [vmem:[%s4709_s16] sm:$0xff]   ;;  %v4421_v7 = vld [vmem:[%s4709_s16 + $0x8] sm:$0xff]   ;;  %v4422_v8 = vld [vmem:[%s4709_s16 + $0x10] sm:$0xff]   ;;  %s1550_s15 = scalar_lea.vmem %s317_s14, %s4062_s11  ;;  %s4568_s14 = smov 8  }
  0x21   : > { %4146 = vmatprep.mubr.msk.bf16.mxu0 %vm388_vm2, %v4420_v6  ;;  %v4424_v10 = vld [vmem:[%s1446_s26] sm:$0xff]   ;;  %v4423_v11 = vld [vmem:[%s4709_s16 + $0x18] sm:$0xff]   ;;  %v4426_v14 = vld [vmem:[%s4709_s16 + $0x28] sm:$0xff]   ;;  %s4747_s22 = scalar_select %p1438_p1, 1, 0 }
  0x22   : > { %4147 = vmatmul.mubr.msk.bf16.vlgmr.msra.gmra.mrb[0].mxu0 %vm388_vm2, %v4421_v7  ;;  %4165 = vmatmul.mubr.msk.bf16.vlgmr.msra.gmra.mrb[0].mxu1 %vm388_vm2, %v4424_v10  ;;  %v4425_v12 = vld [vmem:[%s4709_s16 + $0x20] sm:$0xff]   ;;  %v4427_v15 = vld [vmem:[%s4709_s16 + $0x30] sm:$0xff]   ;;  %v4428_v16 = vld [vmem:[%s4709_s16 + $0x38] sm:$0xff]   ;;  %s4749_s24 = scalar_select %p1542_p2, 1, 0 }
  0x23   : > { %4150 = vmatprep.mubr.msk.bf16.mxu0 %vm388_vm2, %v4422_v8  ;;  %4169 = vmatpush3.bf16.msra.mxu1 %v1570_v9  ;;  %v4429_v13 = vld [vmem:[%s1550_s15] sm:$0xff]   ;;  %s1440_s25 = scvt.s32.f32 %s4747_s22  ;;  %s4569_s17 = smov 4  }
  0x24   : > { %4170 = vmatprep.mubr.msk.bf16.mxu1 %vm4566_vm1, %v4565_v3  ;;  %4174 = vmatprep.subr.bf16.mxu1 %v4565_v3  ;;  %s1544_s13 = scvt.s32.f32 %s4749_s24  ;;  %s310_s20 = sand.u32 1, %s4539_s28  }
  0x25   : > { %v4768_v47 = vstv %s1440_s25  ;;  %s3876_s21 = sshll.u32 %s310_s20, 6  ;;  %s4082_s24 = sshll.u32 %s4547_s30, 4 }
  0x26   : > { %v4772_v52 = vstv %s1544_s13  ;;  %s5687_s22 = scalar_lea.vmem [#allocation3], %s3876_s21  ;;  %s4033_s25 = sshll.u32 %s4551_s9, 5 }
  0x27   : > { %s3786_s13 = sadd.s32 %s4082_s24, %s4033_s25  ;;  %s3789_s30 = sshll.u32 %s5687_s22, 4  ;;  %s5730_s30 = int_to_ptr.vmem [resolvable:$true] %s3789_s30 }
  0x28   : > { %s4034_s9 = sshll.u32 %s3786_s13, 6  ;;  %s5745_s11 = scalar_lea.sflag [#allocation4], %s310_s20 }
  0x29   : > { %s5737_s26 = scalar_lea.hbm %s5806_s8, %s4034_s9  ;;  %s4469_s15 = scalar_lea.vmem %s5730_s30, 1024 }
  0x2a   : > { %4151 = vmatmul.mubr.msk.bf16.gmra.mrb[4].mxu0 %vm388_vm2, %v4423_v11  ;;  %4171 = vmatmul.mubr.msk.bf16.vlgmr.msra.gmra.mrb[4].mxu1 %vm388_vm2, %v4429_v13  ;;  %p4470_p4 = scmp.ne.s32.totalorder %s5730_s30, %s4469_s15  ;;  %s4570_s21 = smov [#allocation3]  }
  0x2b   : > { %4154 = vmatprep.mubr.msk.bf16.mxu0 %vm388_vm2, %v4425_v12  ;;  %4176 = vmatprep.mubr.msk.bf16.mxu1 %vm4566_vm1, %v4565_v3  ;;  %s4473_s24 = sshll.u32 %s4570_s21, 4  ;;  %s4474_s24 = int_to_ptr.vmem [resolvable:$false] %s4473_s24 }
  0x2c   : > { %p4471_p5 = pnand %p4470_p4, %p4668_p3  ;;  %s4475_s25 = scalar_lea.vmem %s4474_s24, 2048 }
  0x2d   : > { %p4476_p7 = scmp.lt.s32.totalorder %s5730_s30, %s4474_s24  ;;  %p4477_p9 = scmp.lt.s32.totalorder %s4475_s25, %s4469_s15 }
  0x2e   : > { %p4472_p6 = pneg %p4471_p5 }
  0x2f   : > { %p4478_p10 = por %p4477_p9, %p4476_p7 }
  0x31   : > { %p4479_p11 = pnand %p4478_p10, %p4472_p6 }
  0x32   : > { %4155 = vmatmul.mubr.msk.bf16.gmra.mrb[8].mxu0 %vm388_vm2, %v4426_v14 }
  0x33   : > { %4158 = vmatprep.mubr.msk.bf16.mxu0 %vm388_vm2, %v4427_v15 }
  0x3a   : > { %4159 = vmatmul.mubr.msk.bf16.gmra.mrb[12].mxu0 %vm388_vm2, %v4428_v16 }
  0x3b   : > { %4214 = vmatprep.mubr.msk.bf16.mxu0 %vm4566_vm1, %v4565_v3 }
  0xf5   : > { %v4148_v21 = vpop.f32.mrb[0].mxu0  ;;  %v1502_v31 = vpop.f32.mrb[0].mxu1 }
  0xf6   : > { %v460_v22 = vadd.f32 %v4148_v21, %v4745_v20  ;;  %v451_v25 = vpop.f32.mrb[1].mxu0  ;;  %v4757_v34 = vadd.f32 %v4745_v20, %v1502_v31  ;;  %v4166_v35 = vpop.f32.mrb[1].mxu1 }
  0xf7   : > { %v452_v26 = vadd.f32 %v4745_v20, %v451_v25  ;;  %v4149_v27 = vpop.f32.mrb[2].mxu0  ;;  %v1505_v39 = vpop.f32.mrb[2].mxu1 }
  0xf8   : > { %v516_v28 = vmul.f32 0.01, %v460_v22  ;;  %v463_v29 = vadd.f32 %v4149_v27, %v4745_v20  ;;  %v454_v30 = vpop.f32.mrb[3].mxu0  ;;  %v4763_v42 = vmul.f32 0.01, %v4757_v34  ;;  %v4766_v43 = vadd.f32 %v4745_v20, %v1505_v39  ;;  %v4167_v44 = vpop.f32.mrb[3].mxu1 }
  0xf9   : > { %v514_v32 = vmul.f32 0.01, %v452_v26  ;;  %v455_v33 = vadd.f32 %v4745_v20, %v454_v30 }
  0xfa   : > { %v532_v36 = vmax.f32 %v460_v22, %v516_v28  ;;  %v517_v38 = vmul.f32 0.01, %v463_v29  ;;  %v1511_v51 = vmax.f32 %v4757_v34, %v4763_v42  ;;  %v4779_v57 = vmul.f32 0.01, %v4766_v43 }
  0xfb   : > { %v530_v40 = vmax.f32 %v452_v26, %v514_v32  ;;  %v515_v41 = vmul.f32 0.01, %v455_v33 }
  0xfc   : > { %v566_v45 = vrot.slane %v532_v36, 7  ;;  %v533_v46 = vmax.f32 %v463_v29, %v517_v38 }
  0xfd   : > { %v563_v48 = vrot.slane %v530_v40, 7  ;;  %v531_v49 = vmax.f32 %v455_v33, %v515_v41  ;;  %v4152_v50 = vpop.f32.mrb[4].mxu0  ;;  %v4788_v5 = vpop.f32.mrb[4].mxu1 }
  0xfe   : > { %v604_v53 = vsel %vm562_vm3, 0.0, %v566_v45  ;;  %v567_v54 = vrot.slane %v533_v46, 7  ;;  %v4776_v55 = vadd.f32 %v4152_v50, %v4745_v20  ;;  %v467_v56 = vpop.f32.mrb[5].mxu0  ;;  %v4172_v10 = vpop.f32.mrb[5].mxu1 }
  0xff   : > { %v676_v58 = vcombine.high %v604_v53, %v604_v53  ;;  %v683_v59 = vrot.slane %v604_v53, %v4760_v37  ;;  %v603_v60 = vsel %vm562_vm3, 0.0, %v563_v48  ;;  %v564_v61 = vrot.slane %v531_v49, 7  ;;  %v4153_v62 = vpop.f32.mrb[6].mxu0  ;;  %v4795_v15 = vpop.f32.mrb[6].mxu1 }
 0x100   : > { %v635_v63 = vcombine.high %v603_v60, %v603_v60  ;;  %v642_v0 = vrot.slane %v603_v60, %v4760_v37  ;;  %v568_v1 = vsel %vm562_vm3, %v566_v45, %v567_v54  ;;  %v612_v2 = vsel %vm562_vm3, %v567_v54, 0.0  ;;  %v4786_v4 = vpop.f32.mrb[7].mxu0  ;;  %v4173_v21 = vpop.f32.mrb[7].mxu1 }
 0x101   : > { %v690_v6 = vrot.slane %v676_v58, %v4760_v37  ;;  %v691_v7 = vcombine.high %v683_v59, %v683_v59  ;;  %v693_v8 = vcombine.high %v568_v1, %v568_v1  ;;  %v700_v9 = vrot.slane %v568_v1, %v4760_v37 }
 0x102   : > { %v649_v11 = vrot.slane %v635_v63, %v4760_v37  ;;  %v650_v12 = vcombine.high %v642_v0, %v642_v0  ;;  %v716_v13 = vrot.slane %v612_v2, %v4760_v37  ;;  %v565_v14 = vsel %vm562_vm3, %v563_v48, %v564_v61 }
 0x103   : > { %v692_v16 = vcombine.high %v690_v6, %v690_v6  ;;  %v998_v17 = vcombine.low %v691_v7, %v690_v6  ;;  %v707_v18 = vrot.slane %v693_v8, %v4760_v37  ;;  %v708_v19 = vcombine.high %v700_v9, %v700_v9 }
 0x104   : > { %v651_v22 = vcombine.high %v649_v11, %v649_v11  ;;  %v963_v23 = vcombine.low %v642_v0, %v650_v12  ;;  %v611_v24 = vsel %vm562_vm3, %v564_v61, 0.0  ;;  %v652_v25 = vcombine.high %v565_v14, %v565_v14 }
 0x105   : > { %v1012_v26 = vrot.slane %v998_v17, %v4760_v37  ;;  %v709_v27 = vcombine.high %v707_v18, %v707_v18  ;;  %v1014_v28 = vcombine.low %v692_v16, %v700_v9  ;;  %v1015_v29 = vcombine.low %v708_v19, %v707_v18  ;;  %v4800_v30 = vpop.f32.mrb[8].mxu0 }
 0x106   : > { %v964_v31 = vcombine.low %v649_v11, %v651_v22  ;;  %v971_v32 = vrot.slane %v963_v23, %v4760_v37  ;;  %v659_v33 = vrot.slane %v565_v14, %v4760_v37  ;;  %v666_v35 = vrot.slane %v652_v25, %v4760_v37  ;;  %v4805_v36 = vpop.f32.mrb[9].mxu0 }
 0x107   : > { %v1022_v38 = vrot.slane %v1014_v28, %v4760_v37  ;;  %v1029_v39 = vrot.slane %v1015_v29, %v4760_v37  ;;  %v4809_v40 = vcombine.low %v709_v27, %v716_v13  ;;  %v675_v41 = vrot.slane %v611_v24, %v4760_v37  ;;  %v4812_v44 = vpop.f32.mrb[10].mxu0 }
 0x108   : > { %v978_v45 = vrot.slane %v964_v31, %v4760_v37  ;;  %v667_v46 = vcombine.high %v659_v33, %v659_v33  ;;  %v668_v48 = vcombine.high %v666_v35, %v666_v35  ;;  %v520_v49 = vmul.f32 0.01, %v4776_v55  ;;  %v4816_v50 = vpop.f32.mrb[11].mxu0 }
 0x109   : > { %v1030_v53 = vcombine.low %v1022_v38, %v1029_v39  ;;  %v1039_v54 = vrot.slane %v4809_v40, %v4760_v37  ;;  %v997_v58 = vcombine.low %v675_v41, %v683_v59  ;;  %v468_v60 = vadd.f32 %v4745_v20, %v467_v56 }
 0x10a   : > { %v979_v61 = vcombine.low %v971_v32, %v978_v45  ;;  %v980_v63 = vcombine.low %v659_v33, %v667_v46  ;;  %v981_v0 = vcombine.low %v666_v35, %v668_v48  ;;  %v536_v1 = vmax.f32 %v4776_v55, %v520_v49 }
 0x10b   : > { %v4043_v2 = vpack.c.bf16 %v1030_v53, %v1030_v53  ;;  %v1005_v6 = vrot.slane %v997_v58, %v4760_v37  ;;  %v518_v7 = vmul.f32 0.01, %v468_v60  ;;  %v479_v8 = vadd.f32 %v4153_v62, %v4745_v20 }
 0x10c   : > { %v4040_v9 = vpack.c.bf16 %v979_v61, %v979_v61  ;;  %v988_v10 = vrot.slane %v980_v63, %v4760_v37  ;;  %v995_v11 = vrot.slane %v981_v0, %v4760_v37  ;;  %v572_v59 = vrot.slane %v536_v1, 7 }
 0x10d   : > { %v4826_v12 = vrot.slane %v4043_v2, 7  ;;  %v1013_v56 = vcombine.low %v1005_v6, %v1012_v26  ;;  %v534_v13 = vmax.f32 %v468_v60, %v518_v7  ;;  %v521_v14 = vmul.f32 0.01, %v479_v8  ;;  %v4828_v16 = vpop.f32.mrb[12].mxu0 }
 0x10e   : > { %v1344_v55 = vrot.slane %v4040_v9, 7  ;;  %v996_v17 = vcombine.low %v988_v10, %v995_v11  ;;  %v606_v18 = vsel %vm562_vm3, 0.0, %v572_v59  ;;  %v471_v62 = vadd.f32 %v4745_v20, %v4786_v4  ;;  %v4833_v19 = vpop.f32.mrb[13].mxu0 }
 0x10f   : > { %v1354_v21 = vrot.slane %v4826_v12, 4  ;;  %v4042_v22 = vpack.c.bf16 %v1013_v56, %v1013_v56  ;;  %v758_v23 = vcombine.high %v606_v18, %v606_v18  ;;  %v4837_v24 = vrot.slane %v606_v18, %v4760_v37  ;;  %v4839_v25 = vpop.f32.mrb[14].mxu0 }
 0x110   : > { %v1345_v26 = vrot.slane %v1344_v55, 4  ;;  %v4041_v27 = vpack.c.bf16 %v996_v17, %v996_v17  ;;  %v569_v28 = vrot.slane %v534_v13, 7  ;;  %v537_v29 = vmax.f32 %v479_v8, %v521_v14  ;;  %v4841_v31 = vpop.f32.mrb[15].mxu0  ;;  %1417 = vst.msk [vmem:[#allocation2 + $0x8] sm:$0xe] %vm1416_vm4, %v1344_v55 }
 0x111   : > { %v1349_v4 = vrot.slane %v4042_v22, 7  ;;  %v772_v32 = vrot.slane %v758_v23, %v4760_v37  ;;  %v773_v33 = vcombine.high %v4837_v24, %v4837_v24  ;;  %v519_v35 = vmul.f32 0.01, %v471_v62 }
 0x112   : > { %v1346_v39 = vrot.slane %v4041_v27, 7  ;;  %v605_v41 = vsel %vm562_vm3, 0.0, %v569_v28  ;;  %v573_v45 = vrot.slane %v537_v29, 7  ;;  %v4858_v46 = vmul.f32 %v4768_v47, %v1511_v51 }
 0x113   : > { %v1351_v48 = vrot.slane %v1349_v4, 4  ;;  %v774_v49 = vcombine.high %v772_v32, %v772_v32  ;;  %v1082_v53 = vcombine.low %v773_v33, %v772_v32  ;;  %v717_v58 = vcombine.high %v605_v41, %v605_v41 }
 0x114   : > { %v1347_v60 = vsel %vm4849_vm7, %v1345_v26, %v1346_v39  ;;  %v1348_v61 = vrot.slane %v1346_v39, 4  ;;  %v724_v63 = vrot.slane %v605_v41, %v4760_v37  ;;  %v574_v0 = vsel %vm562_vm3, %v572_v59, %v573_v45 }
 0x115   : > { %v1353_v1 = vsel %vm4849_vm7, %v1351_v48, %v4826_v12  ;;  %1419 = vst.msk [vmem:[#allocation2 + $0xc] sm:$0xf] %vm1418_vm6, %v1347_v60  ;;  %v1090_v34 = vrot.slane %v1082_v53, %v4760_v37  ;;  %v731_v42 = vrot.slane %v717_v58, %v4760_v37  ;;  %v614_v51 = vsel %vm562_vm3, %v573_v45, 0.0 }
 0x116   : > { %v1350_v2 = vsel %vm4849_vm7, %v1348_v61, %v1349_v4  ;;  %1421 = vst.msk [vmem:[#allocation2 + $0x14] sm:$0xf] %vm1418_vm6, %v1353_v1  ;;  %v732_v6 = vcombine.high %v724_v63, %v724_v63  ;;  %v775_v7 = vcombine.high %v574_v0, %v574_v0  ;;  %v782_v8 = vrot.slane %v574_v0, %v4760_v37 }
 0x117   : > { %1420 = vst.msk [vmem:[#allocation2 + $0x10] sm:$0xf] %vm1418_vm6, %v1350_v2  ;;  %v733_v9 = vcombine.high %v731_v42, %v731_v42  ;;  %v798_v10 = vrot.slane %v614_v51, %v4760_v37  ;;  %v535_v11 = vmax.f32 %v471_v62, %v519_v35  ;;  %v1518_v59 = vrot.slane %v4858_v46, 7 }
 0x118   : > { %v1032_v56 = vcombine.low %v724_v63, %v732_v6  ;;  %v789_v13 = vrot.slane %v775_v7, %v4760_v37  ;;  %v790_v14 = vcombine.high %v782_v8, %v782_v8  ;;  %v1083_v55 = vcombine.low %v774_v49, %v782_v8 }
 0x119   : > { %v1048_v17 = vcombine.low %v731_v42, %v733_v9  ;;  %v570_v18 = vrot.slane %v535_v11, 7  ;;  %v1524_v22 = vsel %vm562_vm3, 0.0, %v1518_v59  ;;  %v1512_v23 = vmax.f32 %v4766_v43, %v4779_v57 }
 0x11a   : > { %v1046_v26 = vrot.slane %v1032_v56, %v4760_v37  ;;  %v791_v27 = vcombine.high %v789_v13, %v789_v13  ;;  %v1097_v29 = vrot.slane %v1083_v55, %v4760_v37  ;;  %v1099_v62 = vcombine.low %v790_v14, %v789_v13 }
 0x11b   : > { %v1056_v4 = vrot.slane %v1048_v17, %v4760_v37  ;;  %v571_v32 = vsel %vm562_vm3, %v569_v28, %v570_v18  ;;  %v613_v33 = vsel %vm562_vm3, %v570_v18, 0.0  ;;  %v4059_v35 = vpack.c.bf16 %v1524_v22, %v1524_v22 }
 0x11c   : > { %v1047_v39 = vcombine.low %v1039_v54, %v1046_v26  ;;  %v1098_v41 = vcombine.low %v1090_v34, %v1097_v29  ;;  %v1100_v43 = vcombine.low %v791_v27, %v798_v10  ;;  %v1107_v57 = vrot.slane %v1099_v62, %v4760_v37 }
 0x11d   : > { %v734_v45 = vcombine.high %v571_v32, %v571_v32  ;;  %v741_v46 = vrot.slane %v571_v32, %v4760_v37  ;;  %v757_v48 = vrot.slane %v613_v33, %v4760_v37  ;;  %1539 = vst.msk [vmem:[#allocation2] sm:$0xf] %vm1418_vm6, %v4059_v35  ;;  %v1515_v28 = vmul.f32 %v4768_v47, %v1512_v23 }
 0x11e   : > { %v4044_v49 = vpack.c.bf16 %v1047_v39, %v1047_v39  ;;  %v1114_v53 = vrot.slane %v1100_v43, %v4760_v37  ;;  %v4047_v58 = vpack.c.bf16 %v1098_v41, %v1098_v41  ;;  %v492_v40 = vadd.f32 %v4800_v30, %v4745_v20 }
 0x11f   : > { %v748_v54 = vrot.slane %v734_v45, %v4760_v37  ;;  %v749_v60 = vcombine.high %v741_v46, %v741_v46  ;;  %v1066_v61 = vcombine.low %v757_v48, %v4837_v24  ;;  %v1519_v63 = vrot.slane %v1515_v28, 7 }
 0x120   : > { %v1355_v0 = vrot.slane %v4044_v49, 7  ;;  %v1115_v1 = vcombine.low %v1107_v57, %v1114_v53  ;;  %v4900_v34 = vrot.slane %v4047_v58, 7  ;;  %v524_v42 = vmul.f32 0.01, %v492_v40 }
 0x121   : > { %v750_v51 = vcombine.high %v748_v54, %v748_v54  ;;  %v1049_v47 = vcombine.low %v741_v46, %v749_v60  ;;  %v1080_v2 = vrot.slane %v1066_v61, %v4760_v37  ;;  %v1520_v6 = vsel %vm562_vm3, %v1518_v59, %v1519_v63 }
 0x122   : > { %v1356_v30 = vsel %vm4849_vm7, %v1354_v21, %v1355_v0  ;;  %v1357_v7 = vrot.slane %v1355_v0, 4  ;;  %v4048_v8 = vpack.c.bf16 %v1115_v1, %v1115_v1  ;;  %v1366_v24 = vrot.slane %v4900_v34, 4 }
 0x123   : > { %1422 = vst.msk [vmem:[#allocation2 + $0x18] sm:$0xf] %vm1418_vm6, %v1356_v30  ;;  %v1063_v9 = vrot.slane %v1049_v47, %v4760_v37  ;;  %v1065_v10 = vcombine.low %v748_v54, %v750_v51  ;;  %v1525_v11 = vsel %vm562_vm3, %v1519_v63, 0.0  ;;  %v4060_v56 = vpack.c.bf16 %v1520_v6, %v1520_v6 }
 0x124   : > { %v4912_v13 = vrot.slane %v4048_v8, 7  ;;  %v4061_v59 = vpack.c.bf16 %v1525_v11, %v1525_v11  ;;  %v540_v14 = vmax.f32 %v492_v40, %v524_v42  ;;  %v484_v12 = vadd.f32 %v4745_v20, %v4805_v36 }
 0x125   : > { %v1064_v21 = vcombine.low %v1056_v4, %v1063_v9  ;;  %v1073_v55 = vrot.slane %v1065_v10, %v4760_v37  ;;  %1540 = vst.msk [vmem:[#allocation2 + $0x4] sm:$0xf] %vm1418_vm6, %v4060_v56  ;;  %v495_v17 = vadd.f32 %v4812_v44, %v4745_v20  ;;  %v487_v18 = vadd.f32 %v4745_v20, %v4816_v50 }
 0x126   : > { %v1368_v22 = vsel %vm4849_vm7, %v1366_v24, %v4912_v13  ;;  %v1369_v23 = vrot.slane %v4912_v13, 4  ;;  %1541 = vst.msk [vmem:[#allocation2 + $0x8] sm:$0x1] %vm1436_vm8, %v4061_v59  ;;  %v578_v36 = vrot.slane %v540_v14, 7  ;;  %v522_v26 = vmul.f32 0.01, %v484_v12 }
 0x127   : > { %1426 = vst.msk [vmem:[#allocation2 + $0x28] sm:$0xf] %vm1418_vm6, %v1368_v22  ;;  %v1081_v27 = vcombine.low %v1073_v55, %v1080_v2  ;;  %v4045_v29 = vpack.c.bf16 %v1064_v21, %v1064_v21  ;;  %v525_v62 = vmul.f32 0.01, %v495_v17  ;;  %v523_v4 = vmul.f32 0.01, %v487_v18 }
 0x128   : > { %v608_v44 = vsel %vm562_vm3, 0.0, %v578_v36  ;;  %v538_v32 = vmax.f32 %v484_v12, %v522_v26  ;;  %v4931_v50 = vadd.f32 %v4828_v16, %v4745_v20  ;;  %v4935_v33 = vadd.f32 %v4745_v20, %v4833_v19 }
 0x129   : > { %v4046_v35 = vpack.c.bf16 %v1081_v27, %v1081_v27  ;;  %v1358_v39 = vrot.slane %v4045_v29, 7  ;;  %v840_v41 = vcombine.high %v608_v44, %v608_v44  ;;  %v847_v43 = vrot.slane %v608_v44, %v4760_v37 }
 0x12a   : > { %v575_v57 = vrot.slane %v538_v32, 7  ;;  %v541_v45 = vmax.f32 %v495_v17, %v525_v62  ;;  %v539_v46 = vmax.f32 %v487_v18, %v523_v4  ;;  %v528_v48 = vmul.f32 0.01, %v4931_v50 }
 0x12b   : > { %v1359_v28 = vsel %vm4849_vm7, %v1357_v7, %v1358_v39  ;;  %v1360_v49 = vrot.slane %v1358_v39, 4  ;;  %v1361_v16 = vrot.slane %v4046_v35, 7  ;;  %v854_v53 = vrot.slane %v840_v41, %v4760_v37 }
 0x12c   : > { %1423 = vst.msk [vmem:[#allocation2 + $0x1c] sm:$0xf] %vm1418_vm6, %v1359_v28  ;;  %v855_v19 = vcombine.high %v847_v43, %v847_v43  ;;  %v607_v58 = vsel %vm562_vm3, 0.0, %v575_v57  ;;  %v579_v40 = vrot.slane %v541_v45, 7  ;;  %v576_v54 = vrot.slane %v539_v46, 7 }
 0x12d   : > { %v1362_v60 = vsel %vm4849_vm7, %v1360_v49, %v1361_v16  ;;  %v1363_v61 = vrot.slane %v1361_v16, 4  ;;  %v856_v63 = vcombine.high %v854_v53, %v854_v53  ;;  %v799_v0 = vcombine.high %v607_v58, %v607_v58 }
 0x12e   : > { %1424 = vst.msk [vmem:[#allocation2 + $0x20] sm:$0xf] %vm1418_vm6, %v1362_v60  ;;  %v1151_v1 = vcombine.low %v855_v19, %v854_v53  ;;  %v806_v42 = vrot.slane %v607_v58, %v4760_v37  ;;  %v580_v51 = vsel %vm562_vm3, %v578_v36, %v579_v40  ;;  %v616_v47 = vsel %vm562_vm3, %v579_v40, 0.0 }
 0x12f   : > { %v1365_v2 = vsel %vm4849_vm7, %v1363_v61, %v4900_v34  ;;  %v813_v6 = vrot.slane %v799_v0, %v4760_v37  ;;  %v857_v30 = vcombine.high %v580_v51, %v580_v51  ;;  %v864_v7 = vrot.slane %v580_v51, %v4760_v37 }
 0x130   : > { %1425 = vst.msk [vmem:[#allocation2 + $0x24] sm:$0xf] %vm1418_vm6, %v1365_v2  ;;  %v1165_v8 = vrot.slane %v1151_v1, %v4760_v37  ;;  %v814_v24 = vcombine.high %v806_v42, %v806_v42  ;;  %v880_v9 = vrot.slane %v616_v47, %v4760_v37  ;;  %v577_v10 = vsel %vm562_vm3, %v575_v57, %v576_v54 }
 0x131   : > { %v815_v11 = vcombine.high %v813_v6, %v813_v6  ;;  %v871_v56 = vrot.slane %v857_v30, %v4760_v37  ;;  %v872_v59 = vcombine.high %v864_v7, %v864_v7  ;;  %v1167_v14 = vcombine.low %v856_v63, %v864_v7 }
 0x132   : > { %v1116_v34 = vcombine.low %v806_v42, %v814_v24  ;;  %v615_v12 = vsel %vm562_vm3, %v576_v54, 0.0  ;;  %v816_v21 = vcombine.high %v577_v10, %v577_v10  ;;  %v823_v55 = vrot.slane %v577_v10, %v4760_v37 }
 0x133   : > { %v1117_v17 = vcombine.low %v813_v6, %v815_v11  ;;  %v873_v18 = vcombine.high %v871_v56, %v871_v56  ;;  %v1168_v22 = vcombine.low %v872_v59, %v871_v56  ;;  %v1175_v36 = vrot.slane %v1167_v14, %v4760_v37 }
 0x134   : > { %v1124_v26 = vrot.slane %v1116_v34, %v4760_v37  ;;  %v830_v27 = vrot.slane %v816_v21, %v4760_v37  ;;  %v831_v29 = vcombine.high %v823_v55, %v823_v55  ;;  %v839_v62 = vrot.slane %v615_v12, %v4760_v37 }
 0x135   : > { %v1131_v4 = vrot.slane %v1117_v17, %v4760_v37  ;;  %v1182_v44 = vrot.slane %v1168_v22, %v4760_v37  ;;  %v4968_v32 = vcombine.low %v873_v18, %v880_v9  ;;  %v544_v35 = vmax.f32 %v4931_v50, %v528_v48 }
 0x136   : > { %v832_v39 = vcombine.high %v830_v27, %v830_v27  ;;  %v1133_v41 = vcombine.low %v823_v55, %v831_v29  ;;  %v1150_v57 = vcombine.low %v839_v62, %v847_v43  ;;  %v526_v45 = vmul.f32 0.01, %v4935_v33 }
 0x137   : > { %v1132_v46 = vcombine.low %v1124_v26, %v1131_v4  ;;  %v1183_v28 = vcombine.low %v1175_v36, %v1182_v44  ;;  %v1192_v49 = vrot.slane %v4968_v32, %v4760_v37  ;;  %v584_v16 = vrot.slane %v544_v35, 7 }
 0x138   : > { %v1134_v53 = vcombine.low %v830_v27, %v832_v39  ;;  %v1141_v19 = vrot.slane %v1133_v41, %v4760_v37  ;;  %v1158_v58 = vrot.slane %v1150_v57, %v4760_v37  ;;  %v542_v40 = vmax.f32 %v4935_v33, %v526_v45 }
 0x139   : > { %v4049_v54 = vpack.c.bf16 %v1132_v46, %v1132_v46  ;;  %v4052_v50 = vpack.c.bf16 %v1183_v28, %v1183_v28  ;;  %v610_v48 = vsel %vm562_vm3, 0.0, %v584_v16  ;;  %v511_v43 = vadd.f32 %v4839_v25, %v4745_v20 }
 0x13a   : > { %v1148_v60 = vrot.slane %v1134_v53, %v4760_v37  ;;  %v1166_v61 = vcombine.low %v1158_v58, %v1165_v8  ;;  %v922_v63 = vcombine.high %v610_v48, %v610_v48  ;;  %v4982_v0 = vrot.slane %v610_v48, %v4760_v37 }
 0x13b   : > { %v1370_v1 = vrot.slane %v4049_v54, 7  ;;  %v4984_v42 = vrot.slane %v4052_v50, 7  ;;  %v581_v51 = vrot.slane %v542_v40, 7  ;;  %v529_v47 = vmul.f32 0.01, %v511_v43 }
 0x13c   : > { %v1149_v33 = vcombine.low %v1141_v19, %v1148_v60  ;;  %v4051_v2 = vpack.c.bf16 %v1166_v61, %v1166_v61  ;;  %v936_v6 = vrot.slane %v922_v63, %v4760_v37  ;;  %v937_v30 = vcombine.high %v4982_v0, %v4982_v0 }
 0x13d   : > { %v1371_v25 = vsel %vm4849_vm7, %v1369_v23, %v1370_v1  ;;  %v1372_v7 = vrot.slane %v1370_v1, 4  ;;  %v1381_v8 = vrot.slane %v4984_v42, 4  ;;  %v609_v24 = vsel %vm562_vm3, 0.0, %v581_v51 }
 0x13e   : > { %1427 = vst.msk [vmem:[#allocation2 + $0x2c] sm:$0xf] %vm1418_vm6, %v1371_v25  ;;  %v4050_v9 = vpack.c.bf16 %v1149_v33, %v1149_v33  ;;  %v1376_v10 = vrot.slane %v4051_v2, 7  ;;  %v938_v11 = vcombine.high %v936_v6, %v936_v6  ;;  %v1235_v56 = vcombine.low %v937_v30, %v936_v6 }
 0x13f   : > { %v881_v59 = vcombine.high %v609_v24, %v609_v24  ;;  %v888_v14 = vrot.slane %v609_v24, %v4760_v37  ;;  %v545_v34 = vmax.f32 %v511_v43, %v529_v47  ;;  %v503_v13 = vadd.f32 %v4745_v20, %v4841_v31 }
 0x140   : > { %v1373_v12 = vrot.slane %v4050_v9, 7  ;;  %v1378_v23 = vrot.slane %v1376_v10, 4  ;;  %v1243_v21 = vrot.slane %v1235_v56, %v4760_v37  ;;  %v1607_v55 = vadd.f32 %v4745_v20, %v4788_v5  ;;  %v5038_v9 = vld [vmem:[#allocation2 + $0x10] sm:$0xff]  }
 0x141   : > { %v895_v17 = vrot.slane %v881_v59, %v4760_v37  ;;  %v896_v18 = vcombine.high %v888_v14, %v888_v14  ;;  %v585_v22 = vrot.slane %v545_v34, 7  ;;  %v527_v36 = vmul.f32 0.01, %v503_v13 }
 0x142   : > { %v1374_v26 = vsel %vm4849_vm7, %v1372_v7, %v1373_v12  ;;  %v1375_v27 = vrot.slane %v1373_v12, 4  ;;  %v1380_v31 = vsel %vm4849_vm7, %v1378_v23, %v4984_v42  ;;  %v1613_v29 = vmul.f32 0.01, %v1607_v55  ;;  %v5049_v12 = vld [vmem:[#allocation2 + $0x18] sm:$0xff]  }
 0x143   : > { %1428 = vst.msk [vmem:[#allocation2 + $0x30] sm:$0xf] %vm1418_vm6, %v1374_v26  ;;  %1430 = vst.msk [vmem:[#allocation2 + $0x38] sm:$0xf] %vm1418_vm6, %v1380_v31  ;;  %v897_v62 = vcombine.high %v895_v17, %v895_v17  ;;  %v1185_v5 = vcombine.low %v888_v14, %v896_v18  ;;  %v586_v4 = vsel %vm562_vm3, %v584_v16, %v585_v22  ;;  %v618_v44 = vsel %vm562_vm3, %v585_v22, 0.0 }
 0x144   : > { %v1377_v35 = vsel %vm4849_vm7, %v1375_v27, %v1376_v10  ;;  %v939_v39 = vcombine.high %v586_v4, %v586_v4  ;;  %v946_v41 = vrot.slane %v586_v4, %v4760_v37  ;;  %v962_v57 = vrot.slane %v618_v44, %v4760_v37 }
 0x145   : > { %1429 = vst.msk [vmem:[#allocation2 + $0x34] sm:$0xf] %vm1418_vm6, %v1377_v35  ;;  %v1199_v45 = vrot.slane %v1185_v5, %v4760_v37  ;;  %v1201_v46 = vcombine.low %v895_v17, %v897_v62  ;;  %v543_v28 = vmax.f32 %v503_v13, %v527_v36  ;;  %v1615_v53 = vmax.f32 %v1607_v55, %v1613_v29 }
 0x146   : > { %v953_v19 = vrot.slane %v939_v39, %v4760_v37  ;;  %v954_v16 = vcombine.high %v946_v41, %v946_v41  ;;  %v1236_v58 = vcombine.low %v938_v11, %v946_v41  ;;  %v1610_v40 = vadd.f32 %v4745_v20, %v4795_v15 }
 0x147   : > { %v1200_v54 = vcombine.low %v1192_v49, %v1199_v45  ;;  %v1209_v50 = vrot.slane %v1201_v46, %v4760_v37  ;;  %v582_v48 = vrot.slane %v543_v28, 7  ;;  %v5026_v43 = vmul.f32 %v4772_v52, %v1615_v53 }
 0x148   : > { %v955_v60 = vcombine.high %v953_v19, %v953_v19  ;;  %v1250_v61 = vrot.slane %v1236_v58, %v4760_v37  ;;  %v1252_v63 = vcombine.low %v954_v16, %v953_v19  ;;  %v1614_v1 = vmul.f32 0.01, %v1610_v40  ;;  %v1902_v58 = vld [vmem:[#allocation2 + $0x8] sm:$0xc] }
 0x149   : > { %v4053_v47 = vpack.c.bf16 %v1200_v54, %v1200_v54  ;;  %v583_v33 = vsel %vm562_vm3, %v581_v51, %v582_v48  ;;  %v617_v20 = vsel %vm562_vm3, %v582_v48, 0.0  ;;  %v1622_v15 = vrot.slane %v5026_v43, 7 }
 0x14a   : > { %v1251_v32 = vcombine.low %v1243_v21, %v1250_v61  ;;  %v1253_v49 = vcombine.low %v955_v60, %v962_v57  ;;  %v1260_v2 = vrot.slane %v1252_v63, %v4760_v37  ;;  %v898_v6 = vcombine.high %v583_v33, %v583_v33  ;;  %v1897_v63 = vld [vmem:[#allocation2 + $0x8] sm:$0xe] }
 0x14b   : > { %v5033_v30 = vrot.slane %v4053_v47, 7  ;;  %v905_v25 = vrot.slane %v583_v33, %v4760_v37  ;;  %v921_v7 = vrot.slane %v617_v20, %v4760_v37  ;;  %v1628_v24 = vsel %vm562_vm3, 0.0, %v1622_v15 }
 0x14c   : > { %v1267_v51 = vrot.slane %v1253_v49, %v4760_v37  ;;  %v4056_v10 = vpack.c.bf16 %v1251_v32, %v1251_v32  ;;  %v912_v11 = vrot.slane %v898_v6, %v4760_v37  ;;  %v4063_v56 = vpack.c.bf16 %v1628_v24, %v1628_v24  ;;  %v5088_v32 = vld [vmem:[#allocation2 + $0x20] sm:$0xff]  }
 0x14d   : > { %v1383_v59 = vsel %vm4849_vm7, %v1381_v8, %v5033_v30  ;;  %v1384_v14 = vrot.slane %v5033_v30, 4  ;;  %v913_v34 = vcombine.high %v905_v25, %v905_v25  ;;  %v1219_v13 = vcombine.low %v921_v7, %v4982_v0 }
 0x14e   : > { %1431 = vst.msk [vmem:[#allocation2 + $0x3c] sm:$0xf] %vm1418_vm6, %v1383_v59  ;;  %v1268_v23 = vcombine.low %v1260_v2, %v1267_v51  ;;  %v5052_v21 = vrot.slane %v4056_v10, 7  ;;  %v914_v55 = vcombine.high %v912_v11, %v912_v11  ;;  %v1640_v17 = vrot.slane %v4063_v56, 7  ;;  %v5099_v56 = vld [vmem:[#allocation2 + $0x28] sm:$0xff]  }
 0x14f   : > { %v1202_v18 = vcombine.low %v905_v25, %v913_v34  ;;  %v1233_v42 = vrot.slane %v1219_v13, %v4760_v37  ;;  %v1616_v22 = vmax.f32 %v1610_v40, %v1614_v1  ;;  %v5056_v8 = vrot.slane %v5038_v9, 1 }
 0x150   : > { %v4057_v36 = vpack.c.bf16 %v1268_v23, %v1268_v23  ;;  %v1393_v0 = vrot.slane %v5052_v21, 4  ;;  %v1218_v26 = vcombine.low %v912_v11, %v914_v55  ;;  %v1641_v27 = vrot.slane %v1640_v17, 4  ;;  %1650 = vst.msk [vmem:[#allocation2 + $0x50] sm:$0xe] %vm1416_vm4, %v1640_v17 }
 0x151   : > { %v1216_v31 = vrot.slane %v1202_v18, %v4760_v37  ;;  %v1619_v29 = vmul.f32 %v4772_v52, %v1616_v22  ;;  %v1826_v62 = vrot.slane %v5049_v12, 1  ;;  %v1739_v5 = vshll.u32 %v5038_v9, 16  ;;  %v5073_v52 = vld [vmem:[#allocation2 + $0xc] sm:$0xf] }
 0x152   : > { %v1394_v4 = vrot.slane %v4057_v36, 7  ;;  %v1226_v44 = vrot.slane %v1218_v26, %v4760_v37  ;;  %v1743_v35 = vshrl.u32 %v5038_v9, 16  ;;  %v1747_v39 = vshll.u32 %v5049_v12, 16  ;;  %v5120_v36 = vld [vmem:[#allocation2 + $0x30] sm:$0xff]  }
 0x153   : > { %v1217_v41 = vcombine.low %v1209_v50, %v1216_v31  ;;  %v1623_v57 = vrot.slane %v1619_v29, 7  ;;  %v1827_v45 = vsel %vm1820_vm9, %v5056_v8, %v1826_v62  ;;  %v5071_v46 = vrot.slane %v1739_v5, 1 }
 0x154   : > { %v1395_v28 = vsel %vm4849_vm7, %v1393_v0, %v1394_v4  ;;  %v1396_v53 = vrot.slane %v1394_v4, 4  ;;  %v1234_v19 = vcombine.low %v1226_v44, %v1233_v42  ;;  %1844 = vrot.lane.b32.xlu1 %v1827_v45, %s4568_s14  ;;  %v1749_v16 = vrot.slane %v1747_v39, 1 }
 0x155   : > { %1435 = vst.msk [vmem:[#allocation2 + $0x4c] sm:$0xf] %vm1418_vm6, %v1395_v28  ;;  %v4054_v40 = vpack.c.bf16 %v1217_v41, %v1217_v41  ;;  %v1624_v54 = vsel %vm562_vm3, %v1622_v15, %v1623_v57  ;;  %v1629_v50 = vsel %vm562_vm3, %v1623_v57, 0.0  ;;  %v1745_v48 = vor.u32 %v1743_v35, %v5071_v46 }
 0x156   : > { %1437 = vst.msk [vmem:[#allocation2 + $0x50] sm:$0x1] %vm1436_vm8, %v1396_v53  ;;  %v4055_v43 = vpack.c.bf16 %v1234_v19, %v1234_v19  ;;  %v4064_v60 = vpack.c.bf16 %v1624_v54, %v1624_v54  ;;  %v4065_v61 = vpack.c.bf16 %v1629_v50, %v1629_v50  ;;  %v3949_v1 = vcombine.low %v1902_v58, %v5073_v52 }
 0x157   : > { %v1385_v47 = vrot.slane %v4054_v40, 7  ;;  %v1750_v33 = vsel %vm1722_vm10, %v1745_v48, %v1749_v16  ;;  %v5086_v20 = vcombine.low %v1897_v63, %v5073_v52  ;;  %v1828_v13 = vrot.slane %v5088_v32, 1 }
 0x158   : > { %v1388_v15 = vrot.slane %v4055_v43, 7  ;;  %v1642_v49 = vrot.slane %v4064_v60, 7  ;;  %v1645_v2 = vrot.slane %v4065_v61, 7  ;;  %1803 = vrot.lane.b32.xlu0 %v1750_v33, %s4569_s17  ;;  %v1952_v6 = vrot.slane %v3949_v1, 1 }
 0x159   : > { %v1386_v30 = vsel %vm4849_vm7, %v1384_v14, %v1385_v47  ;;  %v1387_v25 = vrot.slane %v1385_v47, 4  ;;  %v1920_v7 = vshll.u32 %v5086_v20, 16  ;;  %v1918_v14 = vshrl.u32 %v5086_v20, 16 }
 0x15a   : > { %v1390_v24 = vrot.slane %v1388_v15, 4  ;;  %1432 = vst.msk [vmem:[#allocation2 + $0x40] sm:$0xf] %vm1418_vm6, %v1386_v30  ;;  %v1643_v51 = vsel %vm4849_vm7, %v1641_v27, %v1642_v49  ;;  %v1644_v10 = vrot.slane %v1642_v49, 4  ;;  %v1953_v11 = vsel %vm1820_vm9, %v1952_v6, %v5056_v8 }
 0x15b   : > { %v1389_v59 = vsel %vm4849_vm7, %v1387_v25, %v1388_v15  ;;  %1651 = vst.msk [vmem:[#allocation2 + $0x54] sm:$0xf] %vm1418_vm6, %v1643_v51  ;;  %1958 = vrot.lane.b32.xlu1 %v1953_v11, %s4568_s14  ;;  %v1922_v34 = vrot.slane %v1920_v7, 1  ;;  %v1755_v17 = vshll.u32 %v5088_v32, 16  ;;  %v1829_v42 = vsel %vm1820_vm9, %v1826_v62, %v1828_v13  ;;  %v5130_v62 = vld [vmem:[#allocation2 + $0x38] sm:$0xff]  }
 0x15c   : > { %v1392_v23 = vsel %vm4849_vm7, %v1390_v24, %v5052_v21  ;;  %1433 = vst.msk [vmem:[#allocation2 + $0x44] sm:$0xf] %vm1418_vm6, %v1389_v59  ;;  %v1646_v55 = vsel %vm4849_vm7, %v1644_v10, %v1645_v2  ;;  %v1830_v22 = vrot.slane %v5099_v56, 1  ;;  %v1751_v38 = vshrl.u32 %v5049_v12, 16  ;;  %v5165_v25 = vld [vmem:[#allocation2 + $0x18] sm:$0xff]  }
 0x15d   : > { %1434 = vst.msk [vmem:[#allocation2 + $0x48] sm:$0xf] %vm1418_vm6, %v1392_v23  ;;  %v1923_v18 = vor.u32 %v1922_v34, %v1918_v14  ;;  %v1757_v0 = vrot.slane %v1755_v17, 1  ;;  %v1763_v26 = vshll.u32 %v5099_v56, 16  ;;  %v1832_v29 = vrot.slane %v5120_v36, 1  ;;  %v5171_v14 = vld [vmem:[#allocation2 + $0x20] sm:$0xff]  }
 0x15e   : > { %1653 = vst.msk [vmem:[#allocation2 + $0x58] sm:$0x7] %vm1652_vm11, %v1646_v55  ;;  %v1753_v27 = vor.u32 %v1751_v38, %v1749_v16  ;;  %v1831_v31 = vsel %vm1820_vm9, %v1828_v13, %v1830_v22  ;;  %v1759_v4 = vshrl.u32 %v5088_v32, 16  ;;  %v1771_v35 = vshll.u32 %v5120_v36, 16  ;;  %v2288_v7 = vld [vmem:[#allocation2 + $0x10] sm:$0xc] }
 0x15f   : > { %v1924_v21 = vsel %vm1722_vm10, %v1923_v18, %v5071_v46  ;;  %1846 = vrot.lane.b32.xlu1 %v1829_v42, %s4568_s14  ;;  %v1765_v44 = vrot.slane %v1763_v26, 1  ;;  %v1833_v41 = vsel %vm1820_vm9, %v1830_v22, %v1832_v29  ;;  %v1767_v57 = vshrl.u32 %v5099_v56, 16  ;;  %v4441_v1 = vld [vmem:[#allocation2 + $0x50] ss:$0 sps:$4 sm:$0x33]  }
 0x160   : > { %1941 = vrot.lane.b32.xlu0 %v1924_v21, %s4569_s17  ;;  %v1758_v5 = vsel %vm1722_vm10, %v1753_v27, %v1757_v0  ;;  %v1761_v39 = vor.u32 %v1759_v4, %v1757_v0  ;;  %v1834_v45 = vrot.slane %v5130_v62, 1  ;;  %v1773_v19 = vrot.slane %v1771_v35, 1  ;;  %v2289_v34 = vld [vmem:[#allocation2 + $0x14] sm:$0xf]  ;;  %v1654_v22 = vld [vmem:[#allocation2] sm:$0xf] }
 0x161   : > { %v1775_v16 = vshrl.u32 %v5120_v36, 16  ;;  %v1779_v58 = vshll.u32 %v5130_v62, 16  ;;  %v1769_v40 = vor.u32 %v1767_v57, %v1765_v44  ;;  %v1783_v49 = vshrl.u32 %v5130_v62, 16  ;;  %v1655_v21 = vld [vmem:[#allocation2 + $0x4] sm:$0xf] }
 0x162   : > { %v1766_v53 = vsel %vm1722_vm10, %v1761_v39, %v1765_v44  ;;  %v1835_v54 = vsel %vm1820_vm9, %v1832_v29, %v1834_v45  ;;  %v1956_v30 = vrot.slane %v4441_v1, 1  ;;  %v1934_v11 = vshll.u32 %v4441_v1, 16  ;;  %v1656_v4 = vld [vmem:[#allocation2 + $0x8] sm:$0xf]  ;;  %v2308_v39 = vld [vmem:[#allocation2 + $0x10] sm:$0x8] }
 0x163   : > { %1848 = vrot.lane.b32.xlu1 %v1831_v31, %s4568_s14  ;;  %v5140_v28 = vld [vmem:[#allocation2 + $0x40] sm:$0xff]   ;;  %v1774_v43 = vsel %vm1722_vm10, %v1769_v40, %v1773_v19  ;;  %v1777_v60 = vor.u32 %v1775_v16, %v1773_v19  ;;  %v1781_v61 = vrot.slane %v1779_v58, 1  ;;  %v5177_v17 = vcombine.low %v2288_v7, %v2289_v34 }
 0x164   : > { %1805 = vrot.lane.b32.xlu0 %v1758_v5, %s4569_s17  ;;  %v5149_v50 = vrot.slane %v5140_v28, 1  ;;  %v5151_v48 = vld [vmem:[#allocation2 + $0x48] sm:$0xff]   ;;  %v1787_v63 = vshll.u32 %v5140_v28, 16  ;;  %v1791_v51 = vshrl.u32 %v5140_v28, 16  ;;  %v2368_v42 = vshll.u32 %v5165_v25, 16 }
 0x165   : > { %v1954_v33 = vrot.slane %v5151_v48, 1  ;;  %v1782_v15 = vsel %vm1722_vm10, %v1777_v60, %v1781_v61  ;;  %v1926_v6 = vshll.u32 %v5151_v48, 16  ;;  %v1785_v24 = vor.u32 %v1783_v49, %v1781_v61  ;;  %v1673_v16 = vld [vmem:[#allocation2] sm:$0xe] }
 0x166   : > { %v1837_v47 = vsel %vm1820_vm9, %v1834_v45, %v5149_v50  ;;  %v1789_v2 = vrot.slane %v1787_v63, 1  ;;  %v1930_v10 = vshrl.u32 %v5151_v48, 16  ;;  %v1936_v0 = vrot.slane %v1934_v11, 1  ;;  %v4459_v60 = vld [vmem:[%s5801_s3] sm:$0x3f]  }
 0x167   : > { %1850 = vrot.lane.b32.xlu1 %v1833_v41, %s4568_s14  ;;  %v1955_v59 = vsel %vm1820_vm9, %v5149_v50, %v1954_v33  ;;  %v1928_v55 = vrot.slane %v1926_v6, 1  ;;  %v1957_v18 = vsel %vm1820_vm9, %v1954_v33, %v1956_v30  ;;  %v2376_v26 = vshll.u32 %v5171_v14, 16 }
 0x168   : > { %1807 = vrot.lane.b32.xlu0 %v1766_v53, %s4569_s17  ;;  %v1790_v13 = vsel %vm1722_vm10, %v1785_v24, %v1789_v2  ;;  %v5175_v23 = vor.u32 %v1791_v51, %v1789_v2  ;;  %v2363_v31 = vshll.u32 %v5177_v17, 16  ;;  %v5187_v29 = vcombine.low %v1654_v22, %v1655_v21 }
 0x169   : > { %v1932_v38 = vor.u32 %v1930_v10, %v1928_v55  ;;  %v2370_v5 = vrot.slane %v2368_v42, 1  ;;  %v1938_v35 = vshrl.u32 %v4441_v1, 16  ;;  %v5192_v41 = vcombine.low %v1656_v4, %v5073_v52 }
 0x16a   : > { %v1929_v27 = vsel %vm1722_vm10, %v5175_v23, %v1928_v55  ;;  %v2372_v57 = vshrl.u32 %v5165_v25, 16  ;;  %v2378_v45 = vrot.slane %v2376_v26, 1  ;;  %v2365_v53 = vrot.slane %v2363_v31, 1 }
 0x16b   : > { %1852 = vrot.lane.b32.xlu1 %v1835_v54, %s4568_s14  ;;  %v1937_v44 = vsel %vm1722_vm10, %v1932_v38, %v1936_v0  ;;  %v1726_v19 = vshll.u32 %v5187_v29, 16  ;;  %v3983_v40 = vcombine.low %v2308_v39, %v2289_v34  ;;  %v4456_v54 = vld [vmem:[%s5801_s3 + $0x8] sm:$0x3f]   ;;  %v2361_v52 = vshrl.u32 %v5177_v17, 16 }
 0x16c   : > { %1809 = vrot.lane.b32.xlu0 %v1774_v43, %s4569_s17  ;;  %v2374_v58 = vor.u32 %v2372_v57, %v2370_v5  ;;  %v1940_v43 = vor.u32 %v1938_v35, %v1936_v0  ;;  %v2463_v63 = vrot.slane %v5165_v25, 1  ;;  %v1731_v1 = vshll.u32 %v5192_v41, 16  ;;  %v5218_v34 = vld [vmem:[#allocation2 + $0x28] sm:$0xff]   ;;  %v5230_v0 = vld [vmem:[#allocation2 + $0x30] sm:$0xff]   ;;  %v5239_v35 = vld [vmem:[#allocation2 + $0x38] sm:$0xff]  }
 0x16d   : > { %v2366_v33 = vor.u32 %v2365_v53, %v2361_v52  ;;  %v1728_v49 = vrot.slane %v1726_v19, 1  ;;  %v2462_v2 = vrot.slane %v3983_v40, 1  ;;  %v2050_v6 = vsel %vm2048_vm12, %v4456_v54, 0  ;;  %v5249_v19 = vld [vmem:[#allocation2 + $0x40] sm:$0xff]  }
 0x16e   : > { %v2379_v61 = vsel %vm1722_vm10, %v2374_v58, %v2378_v45  ;;  %4175 = vmatpush3.bf16.msra.mxu1 %v2050_v6  ;;  %v1733_v24 = vrot.slane %v1731_v1, 1  ;;  %v1822_v10 = vrot.slane %v5192_v41, 1  ;;  %v2465_v22 = vrot.slane %v5171_v14, 1  ;;  %v5266_v6 = vld [vmem:[#allocation2 + $0x50] sm:$0xff]  }
 0x16f   : > { %1854 = vrot.lane.b32.xlu1 %v1837_v47, %s4568_s14  ;;  %v3944_v47 = vcombine.low %v1673_v16, %v1655_v21  ;;  %v2464_v7 = vsel %vm1820_vm9, %v2462_v2, %v2463_v63  ;;  %4250 = vmatprep.subr.bf16.mxu1 %v4565_v3  ;;  %v2371_v11 = vsel %vm1722_vm10, %v2366_v33, %v2370_v5  ;;  %v2384_v21 = vshll.u32 %v5218_v34, 16 }
 0x170   : > { %1811 = vrot.lane.b32.xlu0 %v1782_v15, %s4569_s17  ;;  %v1724_v15 = vshrl.u32 %v5187_v29, 16  ;;  %v2466_v26 = vsel %vm1820_vm9, %v2463_v63, %v2465_v22  ;;  %v1825_v4 = vsel %vm1820_vm9, %v1822_v10, %v5056_v8  ;;  %v2467_v39 = vrot.slane %v5218_v34, 1  ;;  %v5259_v63 = vld [vmem:[#allocation2 + $0x48] sm:$0xff]  }
 0x171   : > { %v1821_v51 = vrot.slane %v3944_v47, 1  ;;  %v2386_v31 = vrot.slane %v2384_v21, 1  ;;  %v2392_v57 = vshll.u32 %v5230_v0, 16  ;;  %v2471_v8 = vrot.slane %v5239_v35, 1 }
 0x172   : > { %v2468_v16 = vsel %vm1820_vm9, %v2465_v22, %v2467_v39  ;;  %v2396_v40 = vshrl.u32 %v5230_v0, 16  ;;  %v2400_v54 = vshll.u32 %v5239_v35, 16  ;;  %v2475_v2 = vrot.slane %v5259_v63, 1 }
 0x173   : > { %1960 = vrot.lane.b32.xlu1 %v1955_v59, %s4568_s14  ;;  %v1729_v59 = vor.u32 %v1728_v49, %v1724_v15  ;;  %v1823_v55 = vsel %vm1820_vm9, %v1821_v51, %v1822_v10  ;;  %v2394_v58 = vrot.slane %v2392_v57, 1  ;;  %v2412_v51 = vshrl.u32 %v5249_v19, 16 }
 0x174   : > { %1813 = vrot.lane.b32.xlu0 %v1790_v13, %s4569_s17  ;;  %v1735_v13 = vshrl.u32 %v5192_v41, 16  ;;  %v2402_v33 = vrot.slane %v2400_v54, 1  ;;  %v2420_v21 = vshrl.u32 %v5259_v63, 16 }
 0x175   : > { %v1734_v42 = vsel %vm1722_vm10, %v1729_v59, %v1733_v24  ;;  %v2398_v47 = vor.u32 %v2396_v40, %v2394_v58 }
 0x177   : > { %1962 = vrot.lane.b32.xlu1 %v1957_v18, %s4568_s14  ;;  %v1737_v18 = vor.u32 %v1735_v13, %v1733_v24  ;;  %v2416_v24 = vshll.u32 %v5259_v63, 16 }
 0x178   : > { %1943 = vrot.lane.b32.xlu0 %v1929_v27, %s4569_s17  ;;  %v2380_v27 = vshrl.u32 %v5171_v14, 16 }
 0x179   : > { %v1742_v38 = vsel %vm1722_vm10, %v1737_v18, %v5071_v46  ;;  %v4455_v18 = vld [vmem:[#allocation2 + $0x48] ss:$0 sps:$4 sm:$0x11]   ;;  %v2418_v22 = vrot.slane %v2416_v24, 1 }
 0x17a   : > { %v2382_v5 = vor.u32 %v2380_v27, %v2378_v45  ;;  %v2388_v45 = vshrl.u32 %v5218_v34, 16  ;;  %v1838_v54 = vrot.slane %v4455_v18, 1 }
 0x17b   : > { %1964 = vrot.lane.b32.xlu1 %v1956_v30, %s4568_s14  ;;  %v2181_v30 = vsel %vm2048_vm12, %v4459_v60, 0  ;;  %v2473_v60 = vrot.slane %v5249_v19, 1 }
 0x17c   : > { %1945 = vrot.lane.b32.xlu0 %v1937_v44, %s4569_s17  ;;  %4213 = vmatpush3.bf16.msra.mxu0 %v2181_v30  ;;  %v2469_v44 = vrot.slane %v5230_v0, 1  ;;  %v2387_v46 = vsel %vm1722_vm10, %v2382_v5, %v2386_v31  ;;  %v2403_v30 = vsel %vm1722_vm10, %v2398_v47, %v2402_v33  ;;  %v1795_v5 = vshll.u32 %v4455_v18, 16 }
 0x17d   : > { %v2474_v15 = vsel %vm1820_vm9, %v2471_v8, %v2473_v60  ;;  %v2476_v59 = vsel %vm1820_vm9, %v2473_v60, %v2475_v2  ;;  %v1839_v60 = vsel %vm1820_vm9, %v5149_v50, %v1838_v54  ;;  %v4457_v50 = vld [vmem:[%s5801_s3 + $0x10] sm:$0x3f]  }
 0x17e   : > { %v2470_v53 = vsel %vm1820_vm9, %v2467_v39, %v2469_v44  ;;  %v2472_v52 = vsel %vm1820_vm9, %v2469_v44, %v2471_v8  ;;  %v2422_v44 = vor.u32 %v2420_v21, %v2418_v22 }
 0x17f   : > { %2441 = vrot.lane.b32.xlu1 %v2379_v61, %s4569_s17  ;;  %v2408_v61 = vshll.u32 %v5249_v19, 16 }
 0x180   : > { %1947 = vrot.lane.b32.xlu0 %v1940_v43, %s4569_s17  ;;  %v2390_v43 = vor.u32 %v2388_v45, %v2386_v31  ;;  %v2428_v31 = vshrl.u32 %v5266_v6, 16 }
 0x181   : > { %v2410_v49 = vrot.slane %v2408_v61, 1 }
 0x182   : > { %v2395_v1 = vsel %vm1722_vm10, %v2390_v43, %v2394_v58 }
 0x183   : > { %2481 = vrot.lane.b32.xlu1 %v2464_v7, %s4568_s14  ;;  %v2404_v7 = vshrl.u32 %v5239_v35, 16  ;;  %v2414_v13 = vor.u32 %v2412_v51, %v2410_v49 }
 0x184   : > { %2439 = vrot.lane.b32.xlu0 %v2371_v11, %s4569_s17  ;;  %v4454_v11 = vld [vmem:[#allocation2 + $0x58] ss:$0 sps:$4 sm:$0x77]  }
 0x185   : > { %v2406_v10 = vor.u32 %v2404_v7, %v2402_v33  ;;  %v2479_v27 = vrot.slane %v4454_v11, 1  ;;  %v2432_v39 = vshll.u32 %v4454_v11, 16  ;;  %v2436_v40 = vshrl.u32 %v4454_v11, 16 }
 0x187   : > { %1840 = vrot.lane.b32.xlu1 %v1823_v55, %s4568_s14  ;;  %v2477_v55 = vrot.slane %v5266_v6, 1 }
 0x188   : > { %1799 = vrot.lane.b32.xlu0 %v1734_v42, %s4569_s17  ;;  %v2411_v42 = vsel %vm1722_vm10, %v2406_v10, %v2410_v49  ;;  %v2608_v10 = vsel %vm2048_vm12, %v4457_v50, 0 }
 0x189   : > { %v2480_v57 = vsel %vm1820_vm9, %v2477_v55, %v2479_v27 }
 0x18b   : > { %1801 = vrot.lane.b32.xlu1 %v1742_v38, %s4569_s17  ;;  %v2424_v38 = vshll.u32 %v5266_v6, 16 }
 0x18c   : > { %2483 = vrot.lane.b32.xlu0 %v2466_v26, %s4568_s14  ;;  %v2478_v26 = vsel %vm1820_vm9, %v2475_v2, %v2477_v55 }
 0x18f   : > { %1842 = vrot.lane.b32.xlu1 %v1825_v4, %s4568_s14  ;;  %v2419_v4 = vsel %vm1722_vm10, %v2414_v13, %v2418_v22 }
 0x190   : > { %2443 = vrot.lane.b32.xlu0 %v2387_v46, %s4569_s17  ;;  %v2426_v46 = vrot.slane %v2424_v38, 1 }
 0x192   : > { %v2427_v45 = vsel %vm1722_vm10, %v2422_v44, %v2426_v46  ;;  %v2430_v8 = vor.u32 %v2428_v31, %v2426_v46 }
 0x193   : > { %2487 = vrot.lane.b32.xlu1 %v2470_v53, %s4568_s14  ;;  %v1797_v53 = vrot.slane %v1795_v5, 1 }
 0x194   : > { %2485 = vrot.lane.b32.xlu0 %v2468_v16, %s4568_s14  ;;  %v2434_v16 = vrot.slane %v2432_v39, 1 }
 0x195   : > { %v1798_v58 = vsel %vm1722_vm10, %v5175_v23, %v1797_v53 }
 0x196   : > { %v2435_v43 = vsel %vm1722_vm10, %v2430_v8, %v2434_v16 }
 0x197   : > { %2489 = vrot.lane.b32.xlu1 %v2472_v52, %s4568_s14  ;;  %v2438_v52 = vor.u32 %v2436_v40, %v2434_v16 }
 0x198   : > { %2445 = vrot.lane.b32.xlu0 %v2395_v1, %s4569_s17 }
 0x19b   : > { %2491 = vrot.lane.b32.xlu1 %v2474_v15, %s4568_s14 }
 0x19c   : > { %2447 = vrot.lane.b32.xlu0 %v2403_v30, %s4569_s17 }
 0x19f   : > { %2493 = vrot.lane.b32.xlu1 %v2476_v59, %s4568_s14 }
 0x1a0   : > { %2449 = vrot.lane.b32.xlu0 %v2411_v42, %s4569_s17 }
 0x1a3   : > { %2495 = vrot.lane.b32.xlu1 %v2478_v26, %s4568_s14 }
 0x1a4   : > { %2451 = vrot.lane.b32.xlu0 %v2419_v4, %s4569_s17 }
 0x1a7   : > { %2497 = vrot.lane.b32.xlu1 %v2480_v57, %s4568_s14 }
 0x1a8   : > { %2453 = vrot.lane.b32.xlu0 %v2427_v45, %s4569_s17 }
 0x1ab   : > { %1815 = vrot.lane.b32.xlu1 %v1798_v58, %s4569_s17 }
 0x1ac   : > { %2455 = vrot.lane.b32.xlu0 %v2435_v43, %s4569_s17 }
 0x1af   : > { %1856 = vrot.lane.b32.xlu1 %v1839_v60, %s4568_s14 }
 0x1b0   : > { %2457 = vrot.lane.b32.xlu0 %v2438_v52, %s4569_s17 }
 0x1b4   : > { %2499 = vrot.lane.b32.xlu0 %v2479_v27, %s4568_s14 }
 0x1c6   : > { %v1845_v61 = vpop.permute.xlu1 %1844 }
 0x1ca   : > { %v1804_v23 = vpop.permute.xlu0 %1803 }
 0x1cb   : > { %v1863_v47 = vsel %vm388_vm2, %v5038_v9, %v1804_v23 }
 0x1cc   : > { %v5303_v15 = vsel %vm1876_vm13, %v1863_v47, %v1845_v61 }
 0x1cd   : > { %v1959_v1 = vpop.permute.xlu1 %1958  ;;  %v1997_v7 = vrot.slane %v5303_v15, 1 }
 0x1d1   : > { %v1847_v33 = vpop.permute.xlu1 %1846 }
 0x1d2   : > { %v1942_v49 = vpop.permute.xlu0 %1941 }
 0x1d3   : > { %v1967_v2 = vsel %vm388_vm2, %v5086_v20, %v1942_v49 }
 0x1d4   : > { %v1976_v30 = vsel %vm1876_vm13, %v1967_v2, %v1959_v1 }
 0x1d5   : > { %v1996_v24 = vrot.slane %v1976_v30, 1  ;;  %v1849_v51 = vpop.permute.xlu1 %1848 }
 0x1d6   : > { %v1806_v9 = vpop.permute.xlu0 %1805 }
 0x1d7   : > { %v1865_v11 = vsel %vm388_vm2, %v5049_v12, %v1806_v9  ;;  %v1998_v59 = vsel %vm1820_vm9, %v1996_v24, %v1997_v7 }
 0x1d8   : > { %v5317_v13 = vsel %vm1876_vm13, %v1865_v11, %v1847_v33  ;;  %4177 = vmatmul.mubr.msk.bf16.vlgmr.msra.gmra.mrb[8].mxu1 %vm2020_vm14, %v1998_v59 }
 0x1d9   : > { %4251 = vmatpush3.bf16.msra.mxu1 %v2608_v10  ;;  %v1851_v20 = vpop.permute.xlu1 %1850  ;;  %4180 = vmatprep.mubr.msk.bf16.mxu1 %vm4566_vm1, %v4565_v3  ;;  %v1999_v18 = vrot.slane %v5317_v13, 1 }
 0x1da   : > { %v1808_v55 = vpop.permute.xlu0 %1807 }
 0x1db   : > { %v1867_v42 = vsel %vm388_vm2, %v5088_v32, %v1808_v55  ;;  %v2000_v21 = vsel %vm1820_vm9, %v1997_v7, %v1999_v18 }
 0x1dc   : > { %v5327_v38 = vsel %vm1876_vm13, %v1867_v42, %v1849_v51 }
 0x1dd   : > { %v1853_v22 = vpop.permute.xlu1 %1852  ;;  %v2001_v31 = vrot.slane %v5327_v38, 1 }
 0x1de   : > { %v1810_v12 = vpop.permute.xlu0 %1809 }
 0x1df   : > { %v1869_v5 = vsel %vm388_vm2, %v5099_v56, %v1810_v12  ;;  %v2002_v44 = vsel %vm1820_vm9, %v1999_v18, %v2001_v31 }
 0x1e0   : > { %4181 = vmatmul.mubr.msk.bf16.gmra.mrb[12].mxu1 %vm2020_vm14, %v2000_v21  ;;  %v5337_v46 = vsel %vm1876_vm13, %v1869_v5, %v1851_v20  ;;  %v4458_v20 = vld [vmem:[#allocation2 + $0x50] ss:$0 sps:$4 sm:$0x11]  }
 0x1e1   : > { %v1855_v26 = vpop.permute.xlu1 %1854  ;;  %4184 = vmatprep.mubr.msk.bf16.mxu1 %vm4566_vm1, %v4565_v3  ;;  %v2003_v53 = vrot.slane %v5337_v46, 1 }
 0x1e2   : > { %v1812_v27 = vpop.permute.xlu0 %1811 }
 0x1e3   : > { %v1871_v45 = vsel %vm388_vm2, %v5120_v36, %v1812_v27  ;;  %v2004_v16 = vsel %vm1820_vm9, %v2001_v31, %v2003_v53 }
 0x1e4   : > { %v5347_v58 = vsel %vm1876_vm13, %v1871_v45, %v1853_v22 }
 0x1e5   : > { %v1961_v32 = vpop.permute.xlu1 %1960  ;;  %v2005_v43 = vrot.slane %v5347_v58, 1 }
 0x1e6   : > { %v1814_v4 = vpop.permute.xlu0 %1813 }
 0x1e7   : > { %v1873_v52 = vsel %vm388_vm2, %v5130_v62, %v1814_v4  ;;  %v2006_v61 = vsel %vm1820_vm9, %v2003_v53, %v2005_v43 }
 0x1e8   : > { %4185 = vmatmul.mubr.msk.bf16.gmra.mrb[16].mxu1 %vm2020_vm14, %v2002_v44  ;;  %v5357_v23 = vsel %vm1876_vm13, %v1873_v52, %v1855_v26 }
 0x1e9   : > { %v1963_v39 = vpop.permute.xlu1 %1962  ;;  %4188 = vmatprep.mubr.msk.bf16.mxu1 %vm4566_vm1, %v4565_v3  ;;  %v2007_v33 = vrot.slane %v5357_v23, 1 }
 0x1ea   : > { %v1944_v57 = vpop.permute.xlu0 %1943 }
 0x1eb   : > { %v1969_v50 = vsel %vm388_vm2, %v5140_v28, %v1944_v57  ;;  %v2008_v30 = vsel %vm1820_vm9, %v2005_v43, %v2007_v33 }
 0x1ec   : > { %v1978_v7 = vsel %vm1876_vm13, %v1969_v50, %v1961_v32  ;;  %v4461_v50 = vld [vmem:[%s4709_s16] sm:$0xff]  }
 0x1ed   : > { %v1965_v56 = vpop.permute.xlu1 %1964  ;;  %v2009_v9 = vrot.slane %v1978_v7, 1 }
 0x1ee   : > { %v1946_v8 = vpop.permute.xlu0 %1945 }
 0x1ef   : > { %v1971_v10 = vsel %vm388_vm2, %v5151_v48, %v1946_v8  ;;  %v2010_v11 = vsel %vm1820_vm9, %v2007_v33, %v2009_v9 }
 0x1f0   : > { %4189 = vmatmul.mubr.msk.bf16.gmra.mrb[20].mxu1 %vm2020_vm14, %v2004_v16  ;;  %v1980_v59 = vsel %vm1876_vm13, %v1971_v10, %v1963_v39 }
 0x1f1   : > { %v2442_v40 = vpop.permute.xlu1 %2441  ;;  %4192 = vmatprep.mubr.msk.bf16.mxu1 %vm4566_vm1, %v4565_v3 }
 0x1f2   : > { %v1948_v54 = vpop.permute.xlu0 %1947  ;;  %v2504_v26 = vsel %vm388_vm2, %v5165_v25, %v2442_v40 }
 0x1f3   : > { %v1974_v55 = vsel %vm388_vm2, %v4458_v20, %v1948_v54 }
 0x1f4   : > { %v1982_v42 = vsel %vm1876_vm13, %v1974_v55, %v1965_v56 }
 0x1f5   : > { %v2482_v36 = vpop.permute.xlu1 %2481  ;;  %v2013_v12 = vrot.slane %v1982_v42, 1  ;;  %v4464_v42 = vld [vmem:[%s4709_s16 + $0x18] sm:$0xff]  }
 0x1f6   : > { %v2440_v60 = vpop.permute.xlu0 %2439 }
 0x1f7   : > { %v2502_v27 = vsel %vm388_vm2, %v5177_v17, %v2440_v60 }
 0x1f8   : > { %4193 = vmatmul.mubr.msk.bf16.gmra.mrb[24].mxu1 %vm2020_vm14, %v2006_v61 }
 0x1f9   : > { %v1841_v1 = vpop.permute.xlu1 %1840  ;;  %4196 = vmatprep.mubr.msk.bf16.mxu1 %vm4566_vm1, %v4565_v3 }
 0x1fa   : > { %v1800_v47 = vpop.permute.xlu0 %1799 }
 0x1fb   : > { %v1859_v49 = vsel %vm388_vm2, %v5187_v29, %v1800_v47 }
 0x1fc   : > { %v1878_v62 = vsel %vm1876_vm13, %v1859_v49, %v1841_v1 }
 0x1fd   : > { %4215 = vmatmul.mubr.msk.bf16.vlgmr.msra.gmra.mrb[16].mxu0 %vm2020_vm14, %v1878_v62  ;;  %v1802_v2 = vpop.permute.xlu1 %1801 }
 0x1fe   : > { %4218 = vmatprep.mubr.msk.bf16.mxu0 %vm4566_vm1, %v4565_v3  ;;  %v1861_v29 = vsel %vm388_vm2, %v5192_v41, %v1802_v2  ;;  %v2011_v41 = vrot.slane %v1980_v59, 1  ;;  %v2484_v22 = vpop.permute.xlu0 %2483  ;;  %v4463_v59 = vld [vmem:[%s4709_s16 + $0x10] sm:$0xff]  }
 0x1ff   : > { %v2525_v5 = vsel %vm1876_vm13, %v2504_v26, %v2484_v22  ;;  %v4465_v22 = vld [vmem:[%s4709_s16 + $0x20] sm:$0xff]  }
 0x200   : > { %4197 = vmatmul.mubr.msk.bf16.gmra.mrb[28].mxu1 %vm2020_vm14, %v2008_v30  ;;  %v2012_v18 = vsel %vm1820_vm9, %v2009_v9, %v2011_v41  ;;  %v2014_v31 = vsel %vm1820_vm9, %v2011_v41, %v2013_v12  ;;  %v2557_v32 = vrot.slane %v2525_v5, 2  ;;  %v4467_v5 = vld [vmem:[%s4709_s16 + $0x30] sm:$0xff]  }
 0x201   : > { %v1843_v24 = vpop.permute.xlu1 %1842  ;;  %4200 = vmatprep.mubr.msk.bf16.mxu1 %vm4566_vm1, %v4565_v3 }
 0x202   : > { %v1880_v51 = vsel %vm1876_vm13, %v1861_v29, %v1843_v24  ;;  %v3411_v29 = vld [vmem:[%s5804_s6] sm:$0x3] }
 0x203   : > { %4341 = vmatprep.subr.msk.bf16.mxu0 %vm413_vm0, %v3411_v29 }
 0x205   : > { %4219 = vmatmul.mubr.msk.bf16.gmra.mrb[20].mxu0 %vm2020_vm14, %v1880_v51  ;;  %v2488_v48 = vpop.permute.xlu1 %2487  ;;  %v3413_v51 = vsel %vm413_vm0, %v3411_v29, 0 }
 0x206   : > { %4222 = vmatprep.mubr.msk.bf16.mxu0 %vm4566_vm1, %v4565_v3  ;;  %4289 = vmatpush3.bf16.msra.mxu0 %v3413_v51 }
 0x208   : > { %4201 = vmatmul.mubr.msk.bf16.gmra.mrb[32].mxu1 %vm2020_vm14, %v2010_v11  ;;  %v4462_v11 = vld [vmem:[%s4709_s16 + $0x8] sm:$0xff]  }
 0x209   : > { %4204 = vmatprep.mubr.msk.bf16.mxu1 %vm4566_vm1, %v4565_v3  ;;  %v2490_v21 = vpop.permute.xlu1 %2489 }
 0x20d   : > { %4223 = vmatmul.mubr.msk.bf16.gmra.mrb[24].mxu0 %vm2020_vm14, %v5303_v15  ;;  %v2444_v15 = vpop.permute.xlu0 %2443  ;;  %v2492_v4 = vpop.permute.xlu1 %2491 }
 0x20e   : > { %4226 = vmatprep.mubr.msk.bf16.mxu0 %vm4566_vm1, %v4565_v3  ;;  %v2506_v17 = vsel %vm388_vm2, %v5171_v14, %v2444_v15 }
 0x210   : > { %4205 = vmatmul.mubr.msk.bf16.gmra.mrb[36].mxu1 %vm2020_vm14, %v2012_v18 }
 0x211   : > { %4208 = vmatprep.mubr.msk.bf16.mxu1 %vm4566_vm1, %v4565_v3  ;;  %v2486_v44 = vpop.permute.xlu0 %2485  ;;  %v2494_v53 = vpop.permute.xlu1 %2493 }
 0x212   : > { %v2527_v57 = vsel %vm1876_vm13, %v2506_v17, %v2486_v44 }
 0x213   : > { %v2559_v56 = vrot.slane %v2527_v57, 2 }
 0x215   : > { %4227 = vmatmul.mubr.msk.bf16.gmra.mrb[28].mxu0 %vm2020_vm14, %v5317_v13  ;;  %v2523_v13 = vsel %vm1876_vm13, %v2502_v27, %v2482_v36  ;;  %v2446_v45 = vpop.permute.xlu0 %2445  ;;  %v2496_v14 = vpop.permute.xlu1 %2495  ;;  %v2560_v8 = vsel %vm2048_vm12, %v2557_v32, %v2559_v56 }
 0x216   : > { %4230 = vmatprep.mubr.msk.bf16.mxu0 %vm4566_vm1, %v4565_v3  ;;  %v2556_v39 = vrot.slane %v2523_v13, 2 }
 0x218   : > { %4209 = vmatmul.mubr.msk.bf16.gmra.mrb[40].mxu1 %vm2020_vm14, %v2014_v31  ;;  %v2558_v25 = vsel %vm2048_vm12, %v2556_v39, %v2557_v32  ;;  %v4466_v31 = vld [vmem:[%s4709_s16 + $0x28] sm:$0xff]   ;;  %v4468_v32 = vld [vmem:[%s4709_s16 + $0x38] sm:$0xff]  }
 0x219   : > { %4252 = vmatprep.mubr.msk.bf16.mxu1 %vm4566_vm1, %v4565_v3  ;;  %v2448_v40 = vpop.permute.xlu0 %2447  ;;  %v2498_v43 = vpop.permute.xlu1 %2497 }
 0x21d   : > { %4231 = vmatmul.mubr.msk.bf16.gmra.mrb[32].mxu0 %vm2020_vm14, %v5327_v38  ;;  %v2508_v38 = vsel %vm388_vm2, %v5218_v34, %v2446_v45  ;;  %v2510_v34 = vsel %vm388_vm2, %v5230_v0, %v2448_v40  ;;  %v2450_v36 = vpop.permute.xlu0 %2449  ;;  %v1816_v0 = vpop.permute.xlu1 %1815 }
 0x21e   : > { %4234 = vmatprep.mubr.msk.bf16.mxu0 %vm4566_vm1, %v4565_v3  ;;  %v2529_v16 = vsel %vm1876_vm13, %v2508_v38, %v2488_v48  ;;  %v2531_v52 = vsel %vm1876_vm13, %v2510_v34, %v2490_v21  ;;  %v2512_v61 = vsel %vm388_vm2, %v5239_v35, %v2450_v36  ;;  %v1875_v35 = vsel %vm388_vm2, %v5140_v28, %v1816_v0 }
 0x21f   : > { %v2561_v54 = vrot.slane %v2529_v16, 2  ;;  %v2563_v60 = vrot.slane %v2531_v52, 2  ;;  %v2533_v1 = vsel %vm1876_vm13, %v2512_v61, %v2492_v4  ;;  %v3410_v4 = vld [vmem:[%s5803_s5] sm:$0x3] }
 0x220   : > { %4253 = vmatmul.mubr.msk.bf16.vlgmr.msra.gmra.mrb[44].mxu1 %vm2020_vm14, %v2558_v25  ;;  %v2565_v49 = vrot.slane %v2533_v1, 2  ;;  %4342 = vmatprep.subr.msk.bf16.mxu0 %vm413_vm0, %v3410_v4 }
 0x221   : > { %4256 = vmatprep.mubr.msk.bf16.mxu1 %vm4566_vm1, %v4565_v3  ;;  %v1857_v47 = vpop.permute.xlu1 %1856  ;;  %v2452_v33 = vpop.permute.xlu0 %2451 }
 0x222   : > { %v2514_v62 = vsel %vm388_vm2, %v5249_v19, %v2452_v33  ;;  %v2566_v2 = vsel %vm2048_vm12, %v2563_v60, %v2565_v49 }
 0x223   : > { %v2535_v30 = vsel %vm1876_vm13, %v2514_v62, %v2494_v53 }
 0x224   : > { %v2567_v7 = vrot.slane %v2535_v30, 2 }
 0x225   : > { %4235 = vmatmul.mubr.msk.bf16.gmra.mrb[36].mxu0 %vm2020_vm14, %v5337_v46  ;;  %v2562_v46 = vsel %vm2048_vm12, %v2559_v56, %v2561_v54  ;;  %v2454_v28 = vpop.permute.xlu0 %2453 }
 0x226   : > { %4238 = vmatprep.mubr.msk.bf16.mxu0 %vm4566_vm1, %v4565_v3  ;;  %v2516_v19 = vsel %vm388_vm2, %v5259_v63, %v2454_v28  ;;  %v2568_v24 = vsel %vm2048_vm12, %v2565_v49, %v2567_v7 }
 0x227   : > { %v2537_v9 = vsel %vm1876_vm13, %v2516_v19, %v2496_v14 }
 0x228   : > { %4257 = vmatmul.mubr.msk.bf16.gmra.mrb[48].mxu1 %vm2020_vm14, %v2560_v8  ;;  %v2569_v63 = vrot.slane %v2537_v9, 2 }
 0x229   : > { %4260 = vmatprep.mubr.msk.bf16.mxu1 %vm4566_vm1, %v4565_v3  ;;  %v2456_v10 = vpop.permute.xlu0 %2455 }
 0x22a   : > { %v2518_v41 = vsel %vm388_vm2, %v5266_v6, %v2456_v10  ;;  %v2570_v55 = vsel %vm2048_vm12, %v2567_v7, %v2569_v63  ;;  %v4460_v6 = vld [vmem:[#allocation2 + $0x58] ss:$0 sps:$4 sm:$0x33]  }
 0x22b   : > { %v2539_v48 = vsel %vm1876_vm13, %v2518_v41, %v2498_v43 }
 0x22c   : > { %v2571_v18 = vrot.slane %v2539_v48, 2 }
 0x22d   : > { %4239 = vmatmul.mubr.msk.bf16.gmra.mrb[40].mxu0 %vm2020_vm14, %v5347_v58  ;;  %v2564_v58 = vsel %vm2048_vm12, %v2561_v54, %v2563_v60  ;;  %v2458_v20 = vpop.permute.xlu0 %2457 }
 0x22e   : > { %4242 = vmatprep.mubr.msk.bf16.mxu0 %vm4566_vm1, %v4565_v3  ;;  %v2521_v21 = vsel %vm388_vm2, %v4460_v6, %v2458_v20  ;;  %v2572_v15 = vsel %vm2048_vm12, %v2569_v63, %v2571_v18 }
 0x230   : > { %4261 = vmatmul.mubr.msk.bf16.gmra.mrb[52].mxu1 %vm2020_vm14, %v2562_v46 }
 0x231   : > { %4264 = vmatprep.mubr.msk.bf16.mxu1 %vm4566_vm1, %v4565_v3  ;;  %v2500_v12 = vpop.permute.xlu0 %2499 }
 0x232   : > { %v2541_v26 = vsel %vm1876_vm13, %v2521_v21, %v2500_v12 }
 0x233   : > { %v2573_v27 = vrot.slane %v2541_v26, 2 }
 0x235   : > { %4243 = vmatmul.mubr.msk.bf16.gmra.mrb[44].mxu0 %vm2020_vm14, %v5357_v23  ;;  %v1894_v23 = vsel %vm1876_vm13, %v1875_v35, %v1857_v47  ;;  %v2574_v13 = vsel %vm2048_vm12, %v2571_v18, %v2573_v27 }
 0x236   : > { %4246 = vmatprep.mubr.msk.bf16.mxu0 %vm4566_vm1, %v4565_v3 }
 0x238   : > { %4265 = vmatmul.mubr.msk.bf16.gmra.mrb[56].mxu1 %vm2020_vm14, %v2564_v58 }
 0x239   : > { %4268 = vmatprep.mubr.msk.bf16.mxu1 %vm4566_vm1, %v4565_v3 }
 0x23d   : > { %4247 = vmatmul.mubr.msk.bf16.gmra.mrb[48].mxu0 %vm2020_vm14, %v1894_v23 }
 0x23e   : > { %4290 = vmatprep.mubr.msk.bf16.mxu0 %vm388_vm2, %v4461_v50 }
 0x240   : > { %4269 = vmatmul.mubr.msk.bf16.gmra.mrb[60].mxu1 %vm2020_vm14, %v2566_v2 }
 0x241   : > { %4272 = vmatprep.mubr.msk.bf16.mxu1 %vm4566_vm1, %v4565_v3 }
 0x245   : > { %4291 = vmatmul.mubr.msk.bf16.vlgmr.msra.gmra.mrb[52].mxu0 %vm388_vm2, %v4462_v11 }
 0x246   : > { %4294 = vmatprep.mubr.msk.bf16.mxu0 %vm388_vm2, %v4463_v59 }
 0x248   : > { %4273 = vmatmul.mubr.msk.bf16.gmra.mrb[64].mxu1 %vm2020_vm14, %v2568_v24 }
 0x249   : > { %4276 = vmatprep.mubr.msk.bf16.mxu1 %vm4566_vm1, %v4565_v3 }
 0x24d   : > { %4295 = vmatmul.mubr.msk.bf16.gmra.mrb[56].mxu0 %vm388_vm2, %v4464_v42 }
 0x24e   : > { %4298 = vmatprep.mubr.msk.bf16.mxu0 %vm388_vm2, %v4465_v22 }
 0x250   : > { %4277 = vmatmul.mubr.msk.bf16.gmra.mrb[68].mxu1 %vm2020_vm14, %v2570_v55 }
 0x251   : > { %4280 = vmatprep.mubr.msk.bf16.mxu1 %vm4566_vm1, %v4565_v3 }
 0x255   : > { %4299 = vmatmul.mubr.msk.bf16.gmra.mrb[60].mxu0 %vm388_vm2, %v4466_v31 }
 0x256   : > { %4302 = vmatprep.mubr.msk.bf16.mxu0 %vm388_vm2, %v4467_v5 }
 0x258   : > { %4281 = vmatmul.mubr.msk.bf16.gmra.mrb[72].mxu1 %vm2020_vm14, %v2572_v15 }
 0x259   : > { %4284 = vmatprep.mubr.msk.bf16.mxu1 %vm4566_vm1, %v4565_v3  ;;  %v3537_v3 = vsel %vm413_vm0, %v3410_v4, 0 }
 0x25a   : > { %4307 = vmatpush3.bf16.msra.mxu0 %v3537_v3 }
 0x25d   : > { %4303 = vmatmul.mubr.msk.bf16.gmra.mrb[64].mxu0 %vm388_vm2, %v4468_v32 }
 0x260   : > { %4285 = vmatmul.mubr.msk.bf16.gmra.mrb[76].mxu1 %vm2020_vm14, %v2574_v13 }
 0x2ab   : > { %v2086_v44 = vpop.f32.mrb[8].mxu1 }
 0x2ac   : > { %v4178_v39 = vpop.f32.mrb[9].mxu1 }
 0x2ad   : > { %v2089_v25 = vpop.f32.mrb[10].mxu1 }
 0x2ae   : > { %v4179_v17 = vpop.f32.mrb[11].mxu1 }
 0x2af   : > { %v5543_v17 = vld [vmem:[%s5802_s4] ss:$0 sm:$0xff] }
 0x2b3   : > { %v2094_v57 = vpop.f32.mrb[12].mxu1 }
 0x2b4   : > { %v4182_v53 = vpop.f32.mrb[13].mxu1 }
 0x2b5   : > { %v2097_v45 = vpop.f32.mrb[14].mxu1 }
 0x2b6   : > { %v4183_v56 = vpop.f32.mrb[15].mxu1 }
 0x2bb   : > { %v2102_v38 = vpop.f32.mrb[16].mxu1 }
 0x2bc   : > { %v4186_v14 = vpop.f32.mrb[17].mxu1 }
 0x2bd   : > { %v2105_v8 = vpop.f32.mrb[18].mxu1 }
 0x2be   : > { %v4187_v16 = vpop.f32.mrb[19].mxu1 }
 0x2c3   : > { %v2110_v40 = vpop.f32.mrb[20].mxu1 }
 0x2c4   : > { %v4190_v54 = vpop.f32.mrb[21].mxu1 }
 0x2c5   : > { %v2113_v34 = vpop.f32.mrb[22].mxu1 }
 0x2c6   : > { %v4191_v43 = vpop.f32.mrb[23].mxu1 }
 0x2cb   : > { %v2118_v46 = vpop.f32.mrb[24].mxu1 }
 0x2cc   : > { %v4194_v52 = vpop.f32.mrb[25].mxu1 }
 0x2cd   : > { %v2121_v36 = vpop.f32.mrb[26].mxu1 }
 0x2ce   : > { %v4195_v60 = vpop.f32.mrb[27].mxu1 }
 0x2d0   : > { %v2217_v0 = vpop.f32.mrb[16].mxu0 }
 0x2d1   : > { %v2218_v61 = vadd.f32 %v2217_v0, %v2086_v44  ;;  %v4216_v58 = vpop.f32.mrb[17].mxu0 }
 0x2d2   : > { %v2220_v1 = vpop.f32.mrb[18].mxu0 }
 0x2d3   : > { %v2126_v47 = vpop.f32.mrb[28].mxu1  ;;  %v2221_v33 = vadd.f32 %v2220_v1, %v2089_v25  ;;  %v4217_v49 = vpop.f32.mrb[19].mxu0 }
 0x2d4   : > { %v4198_v35 = vpop.f32.mrb[29].mxu1 }
 0x2d5   : > { %v2129_v23 = vpop.f32.mrb[30].mxu1 }
 0x2d6   : > { %v4199_v62 = vpop.f32.mrb[31].mxu1 }
 0x2d8   : > { %v2225_v50 = vpop.f32.mrb[20].mxu0 }
 0x2d9   : > { %v2226_v2 = vadd.f32 %v2225_v50, %v2094_v57  ;;  %v4220_v30 = vpop.f32.mrb[21].mxu0 }
 0x2da   : > { %v2228_v28 = vpop.f32.mrb[22].mxu0 }
 0x2db   : > { %v5516_v7 = vpop.f32.mrb[32].mxu1  ;;  %v2229_v19 = vadd.f32 %v2228_v28, %v2097_v45  ;;  %v4221_v29 = vpop.f32.mrb[23].mxu0 }
 0x2dc   : > { %v4202_v24 = vpop.f32.mrb[33].mxu1 }
 0x2dd   : > { %v5518_v51 = vpop.f32.mrb[34].mxu1 }
 0x2de   : > { %v4203_v9 = vpop.f32.mrb[35].mxu1 }
 0x2e0   : > { %v2233_v10 = vpop.f32.mrb[24].mxu0 }
 0x2e1   : > { %v5520_v63 = vadd.f32 %v2233_v10, %v2102_v38  ;;  %v4224_v11 = vpop.f32.mrb[25].mxu0 }
 0x2e2   : > { %v2236_v59 = vpop.f32.mrb[26].mxu0 }
 0x2e3   : > { %v5522_v41 = vpop.f32.mrb[36].mxu1  ;;  %v5524_v20 = vadd.f32 %v2236_v59, %v2105_v8  ;;  %v4225_v55 = vpop.f32.mrb[27].mxu0 }
 0x2e4   : > { %v4206_v48 = vpop.f32.mrb[37].mxu1 }
 0x2e5   : > { %v5526_v18 = vpop.f32.mrb[38].mxu1 }
 0x2e6   : > { %v4207_v42 = vpop.f32.mrb[39].mxu1 }
 0x2e8   : > { %v2241_v22 = vpop.f32.mrb[28].mxu0 }
 0x2e9   : > { %v5528_v6 = vadd.f32 %v2241_v22, %v2110_v40  ;;  %v4228_v12 = vpop.f32.mrb[29].mxu0 }
 0x2ea   : > { %v2244_v21 = vpop.f32.mrb[30].mxu0 }
 0x2eb   : > { %v5530_v15 = vpop.f32.mrb[40].mxu1  ;;  %v5532_v26 = vadd.f32 %v2244_v21, %v2113_v34  ;;  %v4229_v27 = vpop.f32.mrb[31].mxu0 }
 0x2ec   : > { %v4210_v31 = vpop.f32.mrb[41].mxu1 }
 0x2ed   : > { %v5534_v5 = vpop.f32.mrb[42].mxu1 }
 0x2ee   : > { %v4211_v13 = vpop.f32.mrb[43].mxu1 }
 0x2f0   : > { %v2249_v32 = vpop.f32.mrb[32].mxu0 }
 0x2f1   : > { %v5536_v4 = vadd.f32 %v2249_v32, %v2118_v46  ;;  %v4232_v3 = vpop.f32.mrb[33].mxu0 }
 0x2f2   : > { %v2252_v44 = vpop.f32.mrb[34].mxu0 }
 0x2f3   : > { %v5538_v39 = vadd.f32 %v2252_v44, %v2121_v36  ;;  %v2644_v25 = vpop.f32.mrb[44].mxu1  ;;  %v4233_v57 = vpop.f32.mrb[35].mxu0 }
 0x2f4   : > { %v2715_v53 = vadd.f32 %v2644_v25, %v2218_v61  ;;  %v4254_v45 = vpop.f32.mrb[45].mxu1 }
 0x2f5   : > { %v2647_v56 = vpop.f32.mrb[46].mxu1 }
 0x2f6   : > { %v2740_v38 = vadd.f32 %v5543_v17, %v2715_v53  ;;  %v2716_v14 = vadd.f32 %v2647_v56, %v2221_v33  ;;  %v4255_v8 = vpop.f32.mrb[47].mxu1 }
 0x2f8   : > { %v2758_v16 = vmul.f32 0.01, %v2740_v38  ;;  %v2741_v40 = vadd.f32 %v5543_v17, %v2716_v14  ;;  %v2257_v54 = vpop.f32.mrb[36].mxu0 }
 0x2f9   : > { %v5547_v34 = vadd.f32 %v2257_v54, %v2126_v47  ;;  %v4236_v43 = vpop.f32.mrb[37].mxu0 }
 0x2fa   : > { %v2776_v46 = vmax.f32 %v2740_v38, %v2758_v16  ;;  %v2759_v52 = vmul.f32 0.01, %v2741_v40  ;;  %v2260_v36 = vpop.f32.mrb[38].mxu0 }
 0x2fb   : > { %v5549_v60 = vadd.f32 %v2260_v36, %v2129_v23  ;;  %v2652_v0 = vpop.f32.mrb[48].mxu1  ;;  %v4237_v61 = vpop.f32.mrb[39].mxu0 }
 0x2fc   : > { %v2812_v58 = vcombine.high %v2776_v46, %v2776_v46  ;;  %v2819_v1 = vrot.slane %v2776_v46, %v4760_v37  ;;  %v2777_v49 = vmax.f32 %v2741_v40, %v2759_v52  ;;  %v2717_v33 = vadd.f32 %v2652_v0, %v2226_v2  ;;  %v4258_v35 = vpop.f32.mrb[49].mxu1 }
 0x2fd   : > { %v2655_v62 = vpop.f32.mrb[50].mxu1 }
 0x2fe   : > { %v2826_v50 = vrot.slane %v2812_v58, %v4760_v37  ;;  %v2827_v30 = vcombine.high %v2819_v1, %v2819_v1  ;;  %v2829_v47 = vcombine.high %v2777_v49, %v2777_v49  ;;  %v2836_v28 = vrot.slane %v2777_v49, %v4760_v37  ;;  %v4259_v29 = vpop.f32.mrb[51].mxu1 }
 0x2ff   : > { %v2742_v24 = vadd.f32 %v5543_v17, %v2717_v33  ;;  %v2718_v23 = vadd.f32 %v2655_v62, %v2229_v19 }
 0x300   : > { %v2828_v9 = vcombine.high %v2826_v50, %v2826_v50  ;;  %v2843_v10 = vrot.slane %v2829_v47, %v4760_v37  ;;  %v2844_v11 = vcombine.high %v2836_v28, %v2836_v28  ;;  %v2265_v59 = vpop.f32.mrb[40].mxu0  ;;  %v3114_v55 = vcombine.low %v2819_v1, %v2827_v30 }
 0x301   : > { %v2760_v48 = vmul.f32 0.01, %v2742_v24  ;;  %v2743_v2 = vadd.f32 %v5543_v17, %v2718_v23  ;;  %v5558_v42 = vadd.f32 %v2265_v59, %v5516_v7  ;;  %v4240_v22 = vpop.f32.mrb[41].mxu0 }
 0x302   : > { %v3115_v12 = vcombine.low %v2826_v50, %v2828_v9  ;;  %v2845_v21 = vcombine.high %v2843_v10, %v2843_v10  ;;  %v3131_v27 = vcombine.low %v2836_v28, %v2844_v11  ;;  %v2268_v31 = vpop.f32.mrb[42].mxu0  ;;  %v3122_v7 = vrot.slane %v3114_v55, %v4760_v37 }
 0x303   : > { %v2778_v13 = vmax.f32 %v2742_v24, %v2760_v48  ;;  %v2761_v32 = vmul.f32 0.01, %v2743_v2  ;;  %v5561_v19 = vadd.f32 %v2268_v31, %v5518_v51  ;;  %v2660_v3 = vpop.f32.mrb[52].mxu1  ;;  %v4241_v44 = vpop.f32.mrb[43].mxu0 }
 0x304   : > { %v3132_v25 = vcombine.low %v2843_v10, %v2845_v21  ;;  %v2719_v57 = vadd.f32 %v2660_v3, %v5520_v63  ;;  %v4262_v53 = vpop.f32.mrb[53].mxu1  ;;  %v3129_v45 = vrot.slane %v3115_v12, %v4760_v37  ;;  %v3139_v16 = vrot.slane %v3131_v27, %v4760_v37 }
 0x305   : > { %v2846_v56 = vcombine.high %v2778_v13, %v2778_v13  ;;  %v2853_v38 = vrot.slane %v2778_v13, %v4760_v37  ;;  %v2779_v14 = vmax.f32 %v2743_v2, %v2761_v32  ;;  %v2663_v8 = vpop.f32.mrb[54].mxu1 }
 0x306   : > { %v2744_v51 = vadd.f32 %v5543_v17, %v2719_v57  ;;  %v2720_v40 = vadd.f32 %v2663_v8, %v5524_v20  ;;  %v4263_v54 = vpop.f32.mrb[55].mxu1  ;;  %v3146_v43 = vrot.slane %v3132_v25, %v4760_v37  ;;  %v3130_v1 = vcombine.low %v3122_v7, %v3129_v45 }
 0x307   : > { %v2860_v63 = vrot.slane %v2846_v56, %v4760_v37  ;;  %v2861_v46 = vcombine.high %v2853_v38, %v2853_v38  ;;  %v2863_v52 = vcombine.high %v2779_v14, %v2779_v14  ;;  %v2870_v36 = vrot.slane %v2779_v14, %v4760_v37 }
 0x308   : > { %v2762_v0 = vmul.f32 0.01, %v2744_v51  ;;  %v2745_v61 = vadd.f32 %v5543_v17, %v2720_v40  ;;  %v2273_v58 = vpop.f32.mrb[44].mxu0  ;;  %v3147_v49 = vcombine.low %v3139_v16, %v3146_v43 }
 0x309   : > { %v3148_v33 = vcombine.low %v2861_v46, %v2860_v63  ;;  %v2862_v35 = vcombine.high %v2860_v63, %v2860_v63  ;;  %v2877_v62 = vrot.slane %v2863_v52, %v4760_v37  ;;  %v2878_v20 = vcombine.high %v2870_v36, %v2870_v36  ;;  %v4244_v50 = vpop.f32.mrb[45].mxu0 }
 0x30a   : > { %v2780_v30 = vmax.f32 %v2744_v51, %v2762_v0  ;;  %v2763_v47 = vmul.f32 0.01, %v2745_v61  ;;  %v5576_v28 = vadd.f32 %v2273_v58, %v5522_v41  ;;  %v2276_v29 = vpop.f32.mrb[46].mxu0  ;;  %v3402_v24 = vpack.c.bf16 %v3147_v49, %v3130_v1 }
 0x30b   : > { %v3149_v23 = vcombine.low %v2862_v35, %v2870_v36  ;;  %v3165_v9 = vcombine.low %v2878_v20, %v2877_v62  ;;  %v2879_v10 = vcombine.high %v2877_v62, %v2877_v62  ;;  %v2668_v11 = vpop.f32.mrb[56].mxu1  ;;  %v4245_v59 = vpop.f32.mrb[47].mxu0  ;;  %v5580_v22 = vadd.f32 %v2276_v29, %v5526_v18 }
 0x30c   : > { %v2880_v55 = vcombine.high %v2780_v30, %v2780_v30  ;;  %v2887_v48 = vrot.slane %v2780_v30, %v4760_v37  ;;  %v2781_v2 = vmax.f32 %v2745_v61, %v2763_v47  ;;  %v4266_v12 = vpop.f32.mrb[57].mxu1  ;;  %4308 = vmatprep.mubr.msk.bf16.mxu0 %vm388_vm2, %v3402_v24  ;;  %v3156_v41 = vrot.slane %v3148_v33, %v4760_v37 }
 0x30d   : > { %v3163_v21 = vrot.slane %v3149_v23, %v4760_v37  ;;  %v2721_v27 = vadd.f32 %v2668_v11, %v5528_v6  ;;  %v2671_v31 = vpop.f32.mrb[58].mxu1  ;;  %v3173_v18 = vrot.slane %v3165_v9, %v4760_v37 }
 0x30e   : > { %v2894_v13 = vrot.slane %v2880_v55, %v4760_v37  ;;  %v3166_v32 = vcombine.low %v2879_v10, %v2887_v48  ;;  %v2896_v3 = vcombine.high %v2781_v2, %v2781_v2  ;;  %v2903_v44 = vrot.slane %v2781_v2, %v4760_v37  ;;  %v4267_v25 = vpop.f32.mrb[59].mxu1 }
 0x30f   : > { %v3164_v57 = vcombine.low %v3156_v41, %v3163_v21  ;;  %v2746_v53 = vadd.f32 %v5543_v17, %v2721_v27  ;;  %v2722_v45 = vadd.f32 %v2671_v31, %v5532_v26 }
 0x310   : > { %v2895_v7 = vcombine.high %v2894_v13, %v2894_v13  ;;  %v3180_v56 = vrot.slane %v3166_v32, %v4760_v37  ;;  %v2910_v6 = vrot.slane %v2896_v3, %v4760_v37  ;;  %v2911_v38 = vcombine.high %v2903_v44, %v2903_v44  ;;  %v2281_v14 = vpop.f32.mrb[48].mxu0 }
 0x311   : > { %v2764_v8 = vmul.f32 0.01, %v2746_v53  ;;  %v2747_v16 = vadd.f32 %v5543_v17, %v2722_v45  ;;  %v5595_v51 = vadd.f32 %v2281_v14, %v5530_v15  ;;  %v4248_v40 = vpop.f32.mrb[49].mxu0 }
 0x312   : > { %v3181_v54 = vcombine.low %v3173_v18, %v3180_v56  ;;  %v3182_v43 = vcombine.low %v2894_v13, %v2895_v7  ;;  %v2912_v63 = vcombine.high %v2910_v6, %v2910_v6  ;;  %v3183_v46 = vcombine.low %v2903_v44, %v2911_v38  ;;  %v2284_v52 = vpop.f32.mrb[50].mxu0 }
 0x313   : > { %v2782_v26 = vmax.f32 %v2746_v53, %v2764_v8  ;;  %v2765_v36 = vmul.f32 0.01, %v2747_v16  ;;  %v5598_v0 = vadd.f32 %v2284_v52, %v5534_v5  ;;  %v2676_v61 = vpop.f32.mrb[60].mxu1  ;;  %v4249_v58 = vpop.f32.mrb[51].mxu0 }
 0x314   : > { %v3403_v1 = vpack.c.bf16 %v3181_v54, %v3164_v57  ;;  %v3197_v49 = vrot.slane %v3183_v46, %v4760_v37  ;;  %v2723_v33 = vadd.f32 %v2676_v61, %v5536_v4  ;;  %v4270_v15 = vpop.f32.mrb[61].mxu1  ;;  %v3190_v30 = vrot.slane %v3182_v43, %v4760_v37 }
 0x315   : > { %v2913_v35 = vcombine.high %v2782_v26, %v2782_v26  ;;  %v2920_v62 = vrot.slane %v2782_v26, %v4760_v37  ;;  %v2783_v20 = vmax.f32 %v2747_v16, %v2765_v36  ;;  %v2679_v50 = vpop.f32.mrb[62].mxu1  ;;  %v3199_v47 = vcombine.low %v2910_v6, %v2912_v63 }
 0x316   : > { %v2748_v29 = vadd.f32 %v5543_v17, %v2723_v33  ;;  %v2724_v5 = vadd.f32 %v2679_v50, %v5538_v39  ;;  %v4271_v24 = vpop.f32.mrb[63].mxu1  ;;  %4309 = vmatmul.mubr.msk.bf16.vlgmr.msra.gmra.mrb[52].mxu0 %vm388_vm2, %v3403_v1  ;;  %v3198_v55 = vcombine.low %v3190_v30, %v3197_v49 }
 0x317   : > { %v2927_v23 = vrot.slane %v2913_v35, %v4760_v37  ;;  %v2928_v9 = vcombine.high %v2920_v62, %v2920_v62  ;;  %v2930_v4 = vcombine.high %v2783_v20, %v2783_v20  ;;  %v2937_v10 = vrot.slane %v2783_v20, %v4760_v37 }
 0x318   : > { %v2766_v11 = vmul.f32 0.01, %v2748_v29  ;;  %v2749_v59 = vadd.f32 %v5543_v17, %v2724_v5  ;;  %v3207_v27 = vrot.slane %v3199_v47, %v4760_v37 }
 0x319   : > { %v2929_v48 = vcombine.high %v2927_v23, %v2927_v23  ;;  %v3200_v2 = vcombine.low %v2920_v62, %v2928_v9  ;;  %v2944_v12 = vrot.slane %v2930_v4, %v4760_v37  ;;  %v2945_v41 = vcombine.high %v2937_v10, %v2937_v10 }
 0x31a   : > { %v2784_v21 = vmax.f32 %v2748_v29, %v2766_v11  ;;  %v2767_v39 = vmul.f32 0.01, %v2749_v59 }
 0x31b   : > { %v3214_v31 = vrot.slane %v3200_v2, %v4760_v37  ;;  %v3216_v13 = vcombine.low %v2929_v48, %v2937_v10  ;;  %v3217_v32 = vcombine.low %v2945_v41, %v2944_v12  ;;  %v2946_v3 = vcombine.high %v2944_v12, %v2944_v12  ;;  %v2684_v44 = vpop.f32.mrb[64].mxu1 }
 0x31c   : > { %v2947_v25 = vcombine.high %v2784_v21, %v2784_v21  ;;  %v2954_v57 = vrot.slane %v2784_v21, %v4760_v37  ;;  %v2785_v18 = vmax.f32 %v2749_v59, %v2767_v39  ;;  %v2725_v53 = vadd.f32 %v2684_v44, %v5547_v34  ;;  %v4274_v45 = vpop.f32.mrb[65].mxu1 }
 0x31d   : > { %v3224_v7 = vrot.slane %v3216_v13, %v4760_v37  ;;  %v2687_v56 = vpop.f32.mrb[66].mxu1  ;;  %v3215_v6 = vcombine.low %v3207_v27, %v3214_v31  ;;  %v3231_v38 = vrot.slane %v3217_v32, %v4760_v37 }
 0x31e   : > { %v2961_v14 = vrot.slane %v2947_v25, %v4760_v37  ;;  %v2962_v8 = vcombine.high %v2954_v57, %v2954_v57  ;;  %v3233_v16 = vcombine.low %v2946_v3, %v2954_v57  ;;  %v2963_v40 = vcombine.high %v2785_v18, %v2785_v18  ;;  %v4275_v54 = vpop.f32.mrb[67].mxu1 }
 0x31f   : > { %v2970_v43 = vrot.slane %v2785_v18, %v4760_v37  ;;  %v2750_v63 = vadd.f32 %v5543_v17, %v2725_v53  ;;  %v2726_v46 = vadd.f32 %v2687_v56, %v5549_v60  ;;  %v3404_v34 = vpack.c.bf16 %v3215_v6, %v3198_v55 }
 0x320   : > { %v3234_v52 = vcombine.low %v2962_v8, %v2961_v14  ;;  %v2977_v26 = vrot.slane %v2963_v40, %v4760_v37  ;;  %v3232_v36 = vcombine.low %v3224_v7, %v3231_v38  ;;  %v3241_v1 = vrot.slane %v3233_v16, %v4760_v37 }
 0x321   : > { %v2768_v61 = vmul.f32 0.01, %v2750_v63  ;;  %v2751_v58 = vadd.f32 %v5543_v17, %v2726_v46  ;;  %4312 = vmatprep.mubr.msk.bf16.mxu0 %vm388_vm2, %v3404_v34  ;;  %v2978_v49 = vcombine.high %v2970_v43, %v2970_v43 }
 0x322   : > { %v2979_v33 = vcombine.high %v2977_v26, %v2977_v26  ;;  %v3248_v15 = vrot.slane %v3234_v52, %v4760_v37 }
 0x323   : > { %v2786_v35 = vmax.f32 %v2750_v63, %v2768_v61  ;;  %v2769_v62 = vmul.f32 0.01, %v2751_v58  ;;  %v2692_v20 = vpop.f32.mrb[68].mxu1  ;;  %v3250_v9 = vcombine.low %v2970_v43, %v2978_v49 }
 0x324   : > { %v3251_v60 = vcombine.low %v2977_v26, %v2979_v33  ;;  %v2727_v50 = vadd.f32 %v2692_v20, %v5558_v42  ;;  %v4278_v30 = vpop.f32.mrb[69].mxu1  ;;  %v3249_v47 = vcombine.low %v3241_v1, %v3248_v15 }
 0x325   : > { %v2980_v29 = vcombine.high %v2786_v35, %v2786_v35  ;;  %v2987_v5 = vrot.slane %v2786_v35, %v4760_v37  ;;  %v2787_v24 = vmax.f32 %v2751_v58, %v2769_v62  ;;  %v2695_v23 = vpop.f32.mrb[70].mxu1  ;;  %v3258_v3 = vrot.slane %v3250_v9, %v4760_v37 }
 0x326   : > { %v2752_v4 = vadd.f32 %v5543_v17, %v2727_v50  ;;  %v2728_v10 = vadd.f32 %v2695_v23, %v5561_v19  ;;  %v4279_v11 = vpop.f32.mrb[71].mxu1  ;;  %v3405_v59 = vpack.c.bf16 %v3249_v47, %v3232_v36  ;;  %v3265_v21 = vrot.slane %v3251_v60, %v4760_v37 }
 0x327   : > { %v2994_v55 = vrot.slane %v2980_v29, %v4760_v37  ;;  %v2995_v48 = vcombine.high %v2987_v5, %v2987_v5  ;;  %v2997_v2 = vcombine.high %v2787_v24, %v2787_v24  ;;  %v3004_v42 = vrot.slane %v2787_v24, %v4760_v37 }
 0x328   : > { %v2770_v12 = vmul.f32 0.01, %v2752_v4  ;;  %v2753_v41 = vadd.f32 %v5543_v17, %v2728_v10  ;;  %4313 = vmatmul.mubr.msk.bf16.gmra.mrb[56].mxu0 %vm388_vm2, %v3405_v59  ;;  %v3266_v16 = vcombine.low %v3258_v3, %v3265_v21 }
 0x329   : > { %v2996_v39 = vcombine.high %v2994_v55, %v2994_v55  ;;  %v3267_v27 = vcombine.low %v2987_v5, %v2995_v48  ;;  %v3011_v31 = vrot.slane %v2997_v2, %v4760_v37  ;;  %v3012_v19 = vcombine.high %v3004_v42, %v3004_v42 }
 0x32a   : > { %v2788_v13 = vmax.f32 %v2752_v4, %v2770_v12  ;;  %v2771_v32 = vmul.f32 0.01, %v2753_v41 }
 0x32b   : > { %v3268_v44 = vcombine.low %v2994_v55, %v2996_v39  ;;  %v3284_v25 = vcombine.low %v3012_v19, %v3011_v31  ;;  %v3013_v57 = vcombine.high %v3011_v31, %v3011_v31  ;;  %v2700_v18 = vpop.f32.mrb[72].mxu1  ;;  %v3275_v38 = vrot.slane %v3267_v27, %v4760_v37 }
 0x32c   : > { %v3014_v53 = vcombine.high %v2788_v13, %v2788_v13  ;;  %v3021_v45 = vrot.slane %v2788_v13, %v4760_v37  ;;  %v2789_v7 = vmax.f32 %v2753_v41, %v2771_v32  ;;  %v2729_v56 = vadd.f32 %v2700_v18, %v5576_v28  ;;  %v4282_v6 = vpop.f32.mrb[73].mxu1 }
 0x32d   : > { %v3292_v14 = vrot.slane %v3284_v25, %v4760_v37  ;;  %v2703_v8 = vpop.f32.mrb[74].mxu1  ;;  %v3282_v40 = vrot.slane %v3268_v44, %v4760_v37 }
 0x32e   : > { %v3028_v54 = vrot.slane %v3014_v53, %v4760_v37  ;;  %v3029_v43 = vcombine.high %v3021_v45, %v3021_v45  ;;  %v3285_v63 = vcombine.low %v3013_v57, %v3021_v45  ;;  %v3031_v46 = vcombine.high %v2789_v7, %v2789_v7  ;;  %v4283_v34 = vpop.f32.mrb[75].mxu1 }
 0x32f   : > { %v3038_v52 = vrot.slane %v2789_v7, %v4760_v37  ;;  %v2754_v26 = vadd.f32 %v5543_v17, %v2729_v56  ;;  %v2730_v28 = vadd.f32 %v2703_v8, %v5580_v22  ;;  %v3283_v36 = vcombine.low %v3275_v38, %v3282_v40 }
 0x330   : > { %v3299_v61 = vrot.slane %v3285_v63, %v4760_v37  ;;  %v3301_v58 = vcombine.low %v3029_v43, %v3028_v54  ;;  %v3030_v1 = vcombine.high %v3028_v54, %v3028_v54  ;;  %v3045_v49 = vrot.slane %v3031_v46, %v4760_v37 }
 0x331   : > { %v2772_v33 = vmul.f32 0.01, %v2754_v26  ;;  %v2755_v15 = vadd.f32 %v5543_v17, %v2730_v28  ;;  %v3406_v35 = vpack.c.bf16 %v3283_v36, %v3266_v16 }
 0x332   : > { %v3046_v62 = vcombine.high %v3045_v49, %v3045_v49  ;;  %v3302_v20 = vcombine.low %v3030_v1, %v3038_v52  ;;  %v3300_v60 = vcombine.low %v3292_v14, %v3299_v61  ;;  %v3309_v24 = vrot.slane %v3301_v58, %v4760_v37 }
 0x333   : > { %v2790_v50 = vmax.f32 %v2754_v26, %v2772_v33  ;;  %v2773_v30 = vmul.f32 0.01, %v2755_v15  ;;  %4316 = vmatprep.mubr.msk.bf16.mxu0 %vm388_vm2, %v3406_v35  ;;  %v2708_v47 = vpop.f32.mrb[76].mxu1 }
 0x334   : > { %v3316_v22 = vrot.slane %v3302_v20, %v4760_v37  ;;  %v2731_v29 = vadd.f32 %v2708_v47, %v5595_v51  ;;  %v4286_v5 = vpop.f32.mrb[77].mxu1  ;;  %v3318_v11 = vcombine.low %v3045_v49, %v3046_v62  ;;  %v5678_v62 = vld [vmem:[%s5805_s7] ss:$0 sm:$0xff] }
 0x335   : > { %v3047_v23 = vcombine.high %v2790_v50, %v2790_v50  ;;  %v3054_v9 = vrot.slane %v2790_v50, %v4760_v37  ;;  %v2791_v4 = vmax.f32 %v2755_v15, %v2773_v30  ;;  %v2711_v10 = vpop.f32.mrb[78].mxu1 }
 0x336   : > { %v2756_v59 = vadd.f32 %v5543_v17, %v2731_v29  ;;  %v2732_v55 = vadd.f32 %v2711_v10, %v5598_v0  ;;  %v4287_v48 = vpop.f32.mrb[79].mxu1  ;;  %v3317_v2 = vcombine.low %v3309_v24, %v3316_v22  ;;  %v3326_v18 = vrot.slane %v3318_v11, %v4760_v37 }
 0x337   : > { %v3061_v42 = vrot.slane %v3047_v23, %v4760_v37  ;;  %v3062_v12 = vcombine.high %v3054_v9, %v3054_v9  ;;  %v3064_v41 = vcombine.high %v2791_v4, %v2791_v4  ;;  %v3071_v51 = vrot.slane %v2791_v4, %v4760_v37 }
 0x338   : > { %v2774_v21 = vmul.f32 0.01, %v2756_v59  ;;  %v2757_v39 = vadd.f32 %v5543_v17, %v2732_v55  ;;  %v3407_v27 = vpack.c.bf16 %v3317_v2, %v3300_v60 }
 0x339   : > { %v3063_v31 = vcombine.high %v3061_v42, %v3061_v42  ;;  %v3319_v19 = vcombine.low %v3054_v9, %v3062_v12  ;;  %v3078_v13 = vrot.slane %v3064_v41, %v4760_v37  ;;  %v3079_v32 = vcombine.high %v3071_v51, %v3071_v51 }
 0x33a   : > { %v2792_v3 = vmax.f32 %v2756_v59, %v2774_v21  ;;  %v2775_v44 = vmul.f32 0.01, %v2757_v39  ;;  %4317 = vmatmul.mubr.msk.bf16.gmra.mrb[60].mxu0 %vm388_vm2, %v3407_v27 }
 0x33b   : > { %v3333_v0 = vrot.slane %v3319_v19, %v4760_v37  ;;  %v3335_v25 = vcombine.low %v3061_v42, %v3063_v31  ;;  %v3336_v57 = vcombine.low %v3071_v51, %v3079_v32  ;;  %v3080_v53 = vcombine.high %v3078_v13, %v3078_v13 }
 0x33c   : > { %v3081_v45 = vcombine.high %v2792_v3, %v2792_v3  ;;  %v3088_v17 = vrot.slane %v2792_v3, %v4760_v37  ;;  %v2793_v7 = vmax.f32 %v2757_v39, %v2775_v44 }
 0x33d   : > { %v3350_v56 = vrot.slane %v3336_v57, %v4760_v37  ;;  %v3334_v6 = vcombine.low %v3326_v18, %v3333_v0  ;;  %v3343_v38 = vrot.slane %v3335_v25, %v4760_v37 }
 0x33e   : > { %v3095_v14 = vrot.slane %v3081_v45, %v4760_v37  ;;  %v3096_v8 = vcombine.high %v3088_v17, %v3088_v17  ;;  %v3352_v16 = vcombine.low %v3080_v53, %v3088_v17  ;;  %v3098_v40 = vcombine.high %v2793_v7, %v2793_v7 }
 0x33f   : > { %v3105_v54 = vrot.slane %v2793_v7, %v4760_v37  ;;  %v3351_v43 = vcombine.low %v3343_v38, %v3350_v56 }
 0x340   : > { %v3353_v63 = vcombine.low %v3096_v8, %v3095_v14  ;;  %v3097_v46 = vcombine.high %v3095_v14, %v3095_v14  ;;  %v3112_v34 = vrot.slane %v3098_v40, %v4760_v37  ;;  %v3360_v28 = vrot.slane %v3352_v16, %v4760_v37 }
 0x341   : > { %v3113_v52 = vcombine.high %v3105_v54, %v3105_v54  ;;  %v3408_v26 = vpack.c.bf16 %v3351_v43, %v3334_v6 }
 0x342   : > { %v3369_v36 = vcombine.low %v3097_v46, %v3105_v54  ;;  %v3367_v61 = vrot.slane %v3353_v63, %v4760_v37 }
 0x343   : > { %v3370_v58 = vcombine.low %v3113_v52, %v3112_v34  ;;  %4320 = vmatprep.mubr.msk.bf16.mxu0 %vm388_vm2, %v3408_v26 }
 0x344   : > { %v3377_v1 = vrot.slane %v3369_v36, %v4760_v37  ;;  %v3368_v49 = vcombine.low %v3360_v28, %v3367_v61 }
 0x345   : > { %v3384_v33 = vrot.slane %v3370_v58, %v4760_v37 }
 0x347   : > { %v3385_v15 = vcombine.low %v3377_v1, %v3384_v33 }
 0x349   : > { %v3409_v35 = vpack.c.bf16 %v3385_v15, %v3368_v49 }
 0x34b   : > { %4321 = vmatmul.mubr.msk.bf16.gmra.mrb[64].mxu0 %vm388_vm2, %v3409_v35 }
 0x3e9   : > { %v4310_v20 = vpop.f32.mrb[52].mxu0 }
 0x3ea   : > { %v3645_v60 = vadd.f32 %v4310_v20, %v5678_v62  ;;  %v3573_v50 = vpop.f32.mrb[53].mxu0 }
 0x3eb   : > { %v3643_v30 = vadd.f32 %v5678_v62, %v3573_v50  ;;  %v4311_v47 = vpop.f32.mrb[54].mxu0 }
 0x3ec   : > { %v3661_v37 = vmul.f32 0.01, %v3645_v60  ;;  %v3646_v22 = vadd.f32 %v4311_v47, %v5678_v62  ;;  %v3576_v29 = vpop.f32.mrb[55].mxu0 }
 0x3ed   : > { %v3659_v5 = vmul.f32 0.01, %v3643_v30  ;;  %v3644_v24 = vadd.f32 %v5678_v62, %v3576_v29 }
 0x3ee   : > { %v3677_v23 = vmax.f32 %v3645_v60, %v3661_v37  ;;  %v3662_v9 = vmul.f32 0.01, %v3646_v22 }
 0x3ef   : > { %v3675_v4 = vmax.f32 %v3643_v30, %v3659_v5  ;;  %v3660_v10 = vmul.f32 0.01, %v3644_v24 }
 0x3f0   : > { %v4068_v11 = vpack.c.bf16 %v3677_v23, %v3677_v23  ;;  %v3678_v59 = vmax.f32 %v3646_v22, %v3662_v9 }
 0x3f1   : > { %v4066_v55 = vpack.c.bf16 %v3675_v4, %v3675_v4  ;;  %v3676_v48 = vmax.f32 %v3644_v24, %v3660_v10 }
 0x3f2   : > { %3758 = vst.msk [vmem:[%s5687_s22 + $0x8] sm:$0xf] %vm3755_vm15, %v4068_v11  ;;  %v4069_v2 = vpack.c.bf16 %v3678_v59, %v3678_v59 }
 0x3f3   : > { %3756 = vst.msk [vmem:[%s5687_s22] sm:$0xf] %vm3755_vm15, %v4066_v55  ;;  %v4067_v42 = vpack.c.bf16 %v3676_v48, %v3676_v48 }
 0x3f4   : > { %3759 = vst.msk [vmem:[%s5687_s22 + $0xc] sm:$0xf] %vm3755_vm15, %v4069_v2 }
 0x3f5   : > { %3757 = vst.msk [vmem:[%s5687_s22 + $0x4] sm:$0xf] %vm3755_vm15, %v4067_v42 }
 0x3fb   : > { %v4314_v12 = vpop.f32.mrb[56].mxu0 }
 0x3fc   : > { %v3649_v41 = vadd.f32 %v4314_v12, %v5678_v62  ;;  %v3589_v51 = vpop.f32.mrb[57].mxu0 }
 0x3fd   : > { %v3647_v21 = vadd.f32 %v5678_v62, %v3589_v51  ;;  %v4315_v39 = vpop.f32.mrb[58].mxu0 }
 0x3fe   : > { %v3665_v27 = vmul.f32 0.01, %v3649_v41  ;;  %v3650_v31 = vadd.f32 %v4315_v39, %v5678_v62  ;;  %v3592_v19 = vpop.f32.mrb[59].mxu0 }
 0x3ff   : > { %v3663_v13 = vmul.f32 0.01, %v3647_v21  ;;  %v3648_v32 = vadd.f32 %v5678_v62, %v3592_v19 }
 0x400   : > { %v3681_v3 = vmax.f32 %v3649_v41, %v3665_v27  ;;  %v3666_v44 = vmul.f32 0.01, %v3650_v31 }
 0x401   : > { %v3679_v0 = vmax.f32 %v3647_v21, %v3663_v13  ;;  %v3664_v25 = vmul.f32 0.01, %v3648_v32 }
 0x402   : > { %v4072_v57 = vpack.c.bf16 %v3681_v3, %v3681_v3  ;;  %v3682_v18 = vmax.f32 %v3650_v31, %v3666_v44 }
 0x403   : > { %v4070_v53 = vpack.c.bf16 %v3679_v0, %v3679_v0  ;;  %v3680_v45 = vmax.f32 %v3648_v32, %v3664_v25 }
 0x404   : > { %3762 = vst.msk [vmem:[%s5687_s22 + $0x18] sm:$0xf] %vm3755_vm15, %v4072_v57  ;;  %v4073_v17 = vpack.c.bf16 %v3682_v18, %v3682_v18 }
 0x405   : > { %3760 = vst.msk [vmem:[%s5687_s22 + $0x10] sm:$0xf] %vm3755_vm15, %v4070_v53  ;;  %v4071_v7 = vpack.c.bf16 %v3680_v45, %v3680_v45 }
 0x406   : > { %3763 = vst.msk [vmem:[%s5687_s22 + $0x1c] sm:$0xf] %vm3755_vm15, %v4073_v17 }
 0x407   : > { %3761 = vst.msk [vmem:[%s5687_s22 + $0x14] sm:$0xf] %vm3755_vm15, %v4071_v7 }
 0x40d   : > { %v4318_v56 = vpop.f32.mrb[60].mxu0 }
 0x40e   : > { %v3653_v6 = vadd.f32 %v4318_v56, %v5678_v62  ;;  %v3605_v38 = vpop.f32.mrb[61].mxu0 }
 0x40f   : > { %v3651_v14 = vadd.f32 %v5678_v62, %v3605_v38  ;;  %v4319_v8 = vpop.f32.mrb[62].mxu0 }
 0x410   : > { %v3669_v16 = vmul.f32 0.01, %v3653_v6  ;;  %v3654_v40 = vadd.f32 %v4319_v8, %v5678_v62  ;;  %v3608_v54 = vpop.f32.mrb[63].mxu0 }
 0x411   : > { %v3667_v43 = vmul.f32 0.01, %v3651_v14  ;;  %v3652_v63 = vadd.f32 %v5678_v62, %v3608_v54 }
 0x412   : > { %v3685_v46 = vmax.f32 %v3653_v6, %v3669_v16  ;;  %v3670_v34 = vmul.f32 0.01, %v3654_v40 }
 0x413   : > { %v3683_v52 = vmax.f32 %v3651_v14, %v3667_v43  ;;  %v3668_v26 = vmul.f32 0.01, %v3652_v63 }
 0x414   : > { %v4076_v28 = vpack.c.bf16 %v3685_v46, %v3685_v46  ;;  %v3686_v36 = vmax.f32 %v3654_v40, %v3670_v34 }
 0x415   : > { %v4074_v61 = vpack.c.bf16 %v3683_v52, %v3683_v52  ;;  %v3684_v58 = vmax.f32 %v3652_v63, %v3668_v26 }
 0x416   : > { %3766 = vst.msk [vmem:[%s5687_s22 + $0x28] sm:$0xf] %vm3755_vm15, %v4076_v28  ;;  %v4077_v1 = vpack.c.bf16 %v3686_v36, %v3686_v36 }
 0x417   : > { %3764 = vst.msk [vmem:[%s5687_s22 + $0x20] sm:$0xf] %vm3755_vm15, %v4074_v61  ;;  %v4075_v49 = vpack.c.bf16 %v3684_v58, %v3684_v58 }
 0x418   : > { %3767 = vst.msk [vmem:[%s5687_s22 + $0x2c] sm:$0xf] %vm3755_vm15, %v4077_v1 }
 0x419   : > { %3765 = vst.msk [vmem:[%s5687_s22 + $0x24] sm:$0xf] %vm3755_vm15, %v4075_v49 }
 0x41e   : > { %v4322_v33 = vpop.f32.mrb[64].mxu0 }
 0x41f   : > { %v3657_v15 = vadd.f32 %v4322_v33, %v5678_v62  ;;  %v3621_v35 = vpop.f32.mrb[65].mxu0 }
 0x420   : > { %v3655_v20 = vadd.f32 %v5678_v62, %v3621_v35  ;;  %v4323_v60 = vpop.f32.mrb[66].mxu0 }
 0x421   : > { %v3673_v50 = vmul.f32 0.01, %v3657_v15  ;;  %v3658_v30 = vadd.f32 %v4323_v60, %v5678_v62  ;;  %v3624_v47 = vpop.f32.mrb[67].mxu0 }
 0x422   : > { %v3671_v37 = vmul.f32 0.01, %v3655_v20  ;;  %v3656_v22 = vadd.f32 %v5678_v62, %v3624_v47 }
 0x423   : > { %v3689_v29 = vmax.f32 %v3657_v15, %v3673_v50  ;;  %v3674_v5 = vmul.f32 0.01, %v3658_v30 }
 0x424   : > { %v3687_v24 = vmax.f32 %v3655_v20, %v3671_v37  ;;  %v3672_v23 = vmul.f32 0.01, %v3656_v22 }
 0x425   : > { %v4080_v9 = vpack.c.bf16 %v3689_v29, %v3689_v29  ;;  %v3690_v4 = vmax.f32 %v3658_v30, %v3674_v5 }
 0x426   : > { %v4078_v10 = vpack.c.bf16 %v3687_v24, %v3687_v24  ;;  %v3688_v11 = vmax.f32 %v3656_v22, %v3672_v23 }
 0x427   : > { %3770 = vst.msk [vmem:[%s5687_s22 + $0x38] sm:$0xf] %vm3755_vm15, %v4080_v9  ;;  %v4081_v59 = vpack.c.bf16 %v3690_v4, %v3690_v4 }
 0x428   : > { %3768 = vst.msk [vmem:[%s5687_s22 + $0x30] sm:$0xf] %vm3755_vm15, %v4078_v10  ;;  %v4079_v62 = vpack.c.bf16 %v3688_v11, %v3688_v11 }
 0x429   : > { %3771 = vst.msk [vmem:[%s5687_s22 + $0x3c] sm:$0xf] %vm3755_vm15, %v4081_v59 }
 0x42a   : > { %3769 = vst.msk [vmem:[%s5687_s22 + $0x34] sm:$0xf] %vm3755_vm15, %v4079_v62 }
 0x42b   : > { %4482 = shalt.err (!%p4479_p11)
}
 0x42c   : > { %s4483_s20 = scalar_lea.hbm %s5737_s26, 1024  ;;  %s4487_s9 = scalar_lea.hbm %s5806_s8, 4096 }
 0x42d   : > { %p4484_p12 = scmp.ne.s32.totalorder %s5737_s26, %s4483_s20  ;;  %p4488_p1 = scmp.lt.u32.totalorder %s5737_s26, %s5806_s8 }
 0x42e   : > { %p4489_p2 = scmp.lt.u32.totalorder %s4487_s9, %s4483_s20  ;;  %p4491_p5 = scmp.lt.u32.totalorder %s4483_s20, %s5737_s26 }
 0x42f   : > { %p4485_p13 = pnand %p4484_p12, %p4668_p3 }
 0x430   : > { %p4490_p4 = por %p4489_p2, %p4488_p1 }
 0x431   : > { %p4486_p0 = pneg %p4485_p13 }
 0x432   : > { %p4492_p6 = por %p4491_p5, %p4490_p4 }
 0x434   : > { %p4493_p7 = pnand %p4492_p6, %p4486_p0 }
 0x436   : > { %4496 = shalt.err (!%p4493_p7)
}
 0x437   : > { %s4571_s15 = smov 64  }
 0x438   : > { %4343 = dma.vmem_to_hbm [thread:$0]  (%p4668_p3), %s5730_s30, 1024, %s5737_s26, %s5745_s11, %s4571_s15, %s4571_s15, %s4569_s17  }
 0x439 PF: > { %p4349_p9 = scmp.ge.s32.totalorder %s4563_s12, 2  ;;  %s3804_s21 = sand.u32 1, %s4535_s27  }
 0x43a   : > { %s3805_s24 = scalar_lea.sflag [#allocation4], %s3804_s21 }
 0x43b   : > { %p4346_p10 = pnand %p4349_p9, %p4677_p8 }
 0x43d   : > { %4530 = dma.done.wait (!%p4346_p10), %s3805_s24, 1024  }
 0x43e   : > { %4532 = vsyncadd (!%p4346_p10), %s3805_s24, 4294966272  ;;  %s21_s12 = sadd.s32 1, %s4563_s12   ;;  %s5817_s9 = sld [smem:[#allocation6_spill]] }
 0x43f   : > { %p18_p11 = scmp.ge.s32.totalorder %s21_s12, 6   ;;  %s5818_s18 = sld [smem:[#allocation7_spill]] }
 0x440   : > { %s5819_s11 = sld [smem:[#allocation8_spill]]  ;;  %s5820_s27 = smov %s4539_s28 }
 0x441   : > { %s5821_s28 = smov %s4543_s29  ;;  %s5822_s29 = smov %s4686_s23 }
 0x442   : > { %s5823_s30 = smov %s4555_s10  ;;  %20 = sbr.rel (!%p18_p11) target bundleno = 5 (0x5), region = 92 }
 0x445   : > { %s5824_s10 = smov %s5818_s18 }
 0x449   :  { %3810 = vsyncpa [#allocation4], 1 }
 0x44a   :  { %3812 = vsyncpa [#allocation4 + $0x1], 1 }

</bundles_post_ra>
